<compile_context>
chip_gen: v7x
topology: tpu7x:2x2x1
jax: 0.10.0
libtpu: 0.0.40
codegen_flags: <defaults>
</compile_context>

<pallas_src>
import jax
import jax.numpy as jnp
from jax import lax
from jax.experimental import pallas as pl
from jax.experimental.pallas import tpu as pltpu

LANE = 128  # TPU lane width; output channels padded to a multiple of this.


def conv_bn_relu_kernel(x_ref, w_ref, bias_ref, o_ref):
    # x_ref:    (1, H+2, W+2, Cin)  zero-padded bf16 input (one batch element)
    # w_ref:    (9*Cin, 128)        bf16 taps, BN scale folded in, Cout padded
    # bias_ref: (1, 128)            f32 folded BN bias (zeros in padded lanes)
    # o_ref:    (1, H*W, 128)       f32 output block (lane-dense: 128 lanes)
    Hp, Wp, Cin = x_ref.shape[1], x_ref.shape[2], x_ref.shape[3]
    H, W = Hp - 2, Wp - 2

    # im2col: pack the nine 3x3 shifted windows along the lane axis.
    taps = []
    for kh in range(3):
        for kw in range(3):
            taps.append(x_ref[0, kh:kh + H, kw:kw + W, :])   # (H, W, Cin) bf16
    lhs = jnp.concatenate(taps, axis=-1)                     # (H, W, 9*Cin)
    lhs = lhs.reshape(H * W, 9 * Cin)                        # layout-preserving

    # One MXU matmul: K = 9*Cin, N = 128 (padded Cout), f32 accumulation.
    acc = jnp.dot(lhs, w_ref[...], preferred_element_type=jnp.float32)

    # Folded BN bias + ReLU in f32, full-width (unmasked) store.
    y = jnp.maximum(acc + bias_ref[...], 0.0)
    o_ref[0] = y.astype(o_ref.dtype)


def conv_block_forward(x_nhwc, w_hwio, gamma, beta, running_mean, running_var,
                       eps=1e-5):
    """3x3 stride-1 conv (pad=1, no bias) + eval-mode BN + ReLU.

    x_nhwc: (N, H, W, Cin) f32;  w_hwio: (3, 3, Cin, Cout) f32.
    Returns (N, H, W, Cout) f32.
    """
    N, H, W, Cin = x_nhwc.shape
    Cout = w_hwio.shape[-1]
    cout_pad = ((Cout + LANE - 1) // LANE) * LANE

    # Fold BN (inference form) into the conv weights and a per-channel bias.
    scale = gamma / jnp.sqrt(running_var + eps)                      # (Cout,)
    bias = beta - running_mean * scale                               # (Cout,)
    w_folded = w_hwio.astype(jnp.float32) * scale[None, None, None, :]
    w2 = w_folded.reshape(9 * Cin, Cout)            # row = (kh*3+kw)*Cin + ci
    w2 = jnp.pad(w2, ((0, 0), (0, cout_pad - Cout))).astype(jnp.bfloat16)
    b2 = jnp.pad(bias.astype(jnp.float32),
                 (0, cout_pad - Cout)).reshape(1, cout_pad)

    # bf16 activations; spatial zero-pad implements padding=1 (stride=1 only).
    x_pad = jnp.pad(x_nhwc.astype(jnp.bfloat16),
                    ((0, 0), (1, 1), (1, 1), (0, 0)))   # (N, H+2, W+2, Cin)

    grid = (N, cout_pad // LANE)
    out = pl.pallas_call(
        conv_bn_relu_kernel,
        out_shape=jax.ShapeDtypeStruct((N, H * W, cout_pad), jnp.float32),
        grid_spec=pltpu.PrefetchScalarGridSpec(
            num_scalar_prefetch=0,
            grid=grid,
            in_specs=[
                pl.BlockSpec((1, H + 2, W + 2, Cin), lambda n, j: (n, 0, 0, 0)),
                pl.BlockSpec((9 * Cin, LANE), lambda n, j: (0, j)),
                pl.BlockSpec((1, LANE), lambda n, j: (0, j)),
            ],
            out_specs=pl.BlockSpec((1, H * W, LANE), lambda n, j: (n, 0, j)),
        ),
        compiler_params=pltpu.CompilerParams(
            dimension_semantics=("parallel", "parallel")),
    )(x_pad, w2, b2)

    # Drop channel padding, restore (N, H, W, Cout).
    return out[:, :, :Cout].reshape(N, H, W, Cout)


def reference_forward(x_nhwc, w_hwio, gamma, beta, running_mean, running_var,
                      eps=1e-5):
    y = lax.conv_general_dilated(
        x_nhwc, w_hwio, window_strides=(1, 1), padding=((1, 1), (1, 1)),
        dimension_numbers=("NHWC", "HWIO", "NHWC"))
    scale = gamma / jnp.sqrt(running_var + eps)
    bias = beta - running_mean * scale
    y = y * scale[None, None, None, :] + bias[None, None, None, :]
    return jnp.maximum(y, 0.0)


if __name__ == "__main__":
    key = jax.random.PRNGKey(0)
    k_x, k_w, k_g, k_b, k_m, k_v = jax.random.split(key, 6)

    # Small shapes: batch=2, inplanes=4, planes=8, spatial=16 (stride=1).
    N, Cin, Cout, H, W = 2, 4, 8, 16, 16

    x_nchw = jax.random.normal(k_x, (N, Cin, H, W), dtype=jnp.float32)
    # PyTorch conv weight is OIHW; build it that way, then convert to HWIO.
    w_oihw = jax.random.normal(k_w, (Cout, Cin, 3, 3), dtype=jnp.float32) * 0.2
    gamma = 1.0 + 0.1 * jax.random.normal(k_g, (Cout,), dtype=jnp.float32)
    beta = 0.1 * jax.random.normal(k_b, (Cout,), dtype=jnp.float32)
    running_mean = 0.1 * jax.random.normal(k_m, (Cout,), dtype=jnp.float32)
    running_var = jnp.abs(jax.random.normal(k_v, (Cout,), dtype=jnp.float32)) + 0.5

    # NCHW -> NHWC, OIHW -> HWIO (kernel layout).
    x_nhwc = jnp.transpose(x_nchw, (0, 2, 3, 1))
    w_hwio = jnp.transpose(w_oihw, (2, 3, 1, 0))

    out = conv_block_forward(x_nhwc, w_hwio, gamma, beta,
                             running_mean, running_var)
    out = jax.block_until_ready(out)

    ref = reference_forward(x_nhwc, w_hwio, gamma, beta,
                            running_mean, running_var)
    assert out.shape == (N, H, W, Cout)
    # Tolerance relaxed vs. pure-f32: bf16 operands on the MXU (f32 accumulate).
    assert jnp.allclose(out, ref, atol=5e-2, rtol=5e-2), (
        float(jnp.max(jnp.abs(out - ref))))

    print("KERNEL_OK")
</pallas_src>

<mosaic_0001>
module attributes {stable_mosaic.version = 11 : i64} {
  func.func @conv_bn_relu_kernel(%arg0: i32, %arg1: i32, %arg2: memref<1x18x18x4xbf16, #tpu.memory_space<vmem>>, %arg3: memref<36x128xbf16, #tpu.memory_space<vmem>>, %arg4: memref<1x128xf32, #tpu.memory_space<vmem>>, %arg5: memref<1x256x128xf32, #tpu.memory_space<vmem>>) attributes {dimension_semantics = [#tpu.dimension_semantics<parallel>, #tpu.dimension_semantics<parallel>], iteration_bounds = array<i64: 2, 1>, scalar_prefetch = 0 : i64, scratch_operands = 0 : i64, tpu.core_type = #tpu.core_type<tc>, window_params = [{transform_indices = @transform_0, window_bounds = array<i64: 1, 18, 18, 4>}, {transform_indices = @transform_1, window_bounds = array<i64: 36, 128>}, {transform_indices = @transform_2, window_bounds = array<i64: 1, 128>}, {transform_indices = @transform_3, window_bounds = array<i64: 1, 256, 128>}]} {
    %c0 = arith.constant 0 : index
    %c0_0 = arith.constant 0 : index
    %c0_1 = arith.constant 0 : index
    %c0_2 = arith.constant 0 : index
    %0 = vector.load %arg2[%c0, %c0_0, %c0_1, %c0_2] : memref<1x18x18x4xbf16, #tpu.memory_space<vmem>>, vector<1x16x16x4xbf16>
    %1 = vector.shape_cast %0 : vector<1x16x16x4xbf16> to vector<16x16x4xbf16>
    %c0_3 = arith.constant 0 : index
    %c0_4 = arith.constant 0 : index
    %c1 = arith.constant 1 : index
    %c0_5 = arith.constant 0 : index
    %2 = vector.load %arg2[%c0_3, %c0_4, %c1, %c0_5] : memref<1x18x18x4xbf16, #tpu.memory_space<vmem>>, vector<1x16x16x4xbf16>
    %3 = vector.shape_cast %2 : vector<1x16x16x4xbf16> to vector<16x16x4xbf16>
    %c0_6 = arith.constant 0 : index
    %c0_7 = arith.constant 0 : index
    %c2 = arith.constant 2 : index
    %c0_8 = arith.constant 0 : index
    %4 = vector.load %arg2[%c0_6, %c0_7, %c2, %c0_8] : memref<1x18x18x4xbf16, #tpu.memory_space<vmem>>, vector<1x16x16x4xbf16>
    %5 = vector.shape_cast %4 : vector<1x16x16x4xbf16> to vector<16x16x4xbf16>
    %c0_9 = arith.constant 0 : index
    %c1_10 = arith.constant 1 : index
    %c0_11 = arith.constant 0 : index
    %c0_12 = arith.constant 0 : index
    %6 = vector.load %arg2[%c0_9, %c1_10, %c0_11, %c0_12] : memref<1x18x18x4xbf16, #tpu.memory_space<vmem>>, vector<1x16x16x4xbf16>
    %7 = vector.shape_cast %6 : vector<1x16x16x4xbf16> to vector<16x16x4xbf16>
    %c0_13 = arith.constant 0 : index
    %c1_14 = arith.constant 1 : index
    %c1_15 = arith.constant 1 : index
    %c0_16 = arith.constant 0 : index
    %8 = vector.load %arg2[%c0_13, %c1_14, %c1_15, %c0_16] : memref<1x18x18x4xbf16, #tpu.memory_space<vmem>>, vector<1x16x16x4xbf16>
    %9 = vector.shape_cast %8 : vector<1x16x16x4xbf16> to vector<16x16x4xbf16>
    %c0_17 = arith.constant 0 : index
    %c1_18 = arith.constant 1 : index
    %c2_19 = arith.constant 2 : index
    %c0_20 = arith.constant 0 : index
    %10 = vector.load %arg2[%c0_17, %c1_18, %c2_19, %c0_20] : memref<1x18x18x4xbf16, #tpu.memory_space<vmem>>, vector<1x16x16x4xbf16>
    %11 = vector.shape_cast %10 : vector<1x16x16x4xbf16> to vector<16x16x4xbf16>
    %c0_21 = arith.constant 0 : index
    %c2_22 = arith.constant 2 : index
    %c0_23 = arith.constant 0 : index
    %c0_24 = arith.constant 0 : index
    %12 = vector.load %arg2[%c0_21, %c2_22, %c0_23, %c0_24] : memref<1x18x18x4xbf16, #tpu.memory_space<vmem>>, vector<1x16x16x4xbf16>
    %13 = vector.shape_cast %12 : vector<1x16x16x4xbf16> to vector<16x16x4xbf16>
    %c0_25 = arith.constant 0 : index
    %c2_26 = arith.constant 2 : index
    %c1_27 = arith.constant 1 : index
    %c0_28 = arith.constant 0 : index
    %14 = vector.load %arg2[%c0_25, %c2_26, %c1_27, %c0_28] : memref<1x18x18x4xbf16, #tpu.memory_space<vmem>>, vector<1x16x16x4xbf16>
    %15 = vector.shape_cast %14 : vector<1x16x16x4xbf16> to vector<16x16x4xbf16>
    %c0_29 = arith.constant 0 : index
    %c2_30 = arith.constant 2 : index
    %c2_31 = arith.constant 2 : index
    %c0_32 = arith.constant 0 : index
    %16 = vector.load %arg2[%c0_29, %c2_30, %c2_31, %c0_32] : memref<1x18x18x4xbf16, #tpu.memory_space<vmem>>, vector<1x16x16x4xbf16>
    %17 = vector.shape_cast %16 : vector<1x16x16x4xbf16> to vector<16x16x4xbf16>
    %18 = tpu.concatenate %1, %3, %5, %7, %9, %11, %13, %15, %17 in 2 : vector<16x16x4xbf16>, vector<16x16x4xbf16>, vector<16x16x4xbf16>, vector<16x16x4xbf16>, vector<16x16x4xbf16>, vector<16x16x4xbf16>, vector<16x16x4xbf16>, vector<16x16x4xbf16>, vector<16x16x4xbf16> -> vector<16x16x36xbf16>
    %19 = vector.shape_cast %18 : vector<16x16x36xbf16> to vector<256x36xbf16>
    %c0_33 = arith.constant 0 : index
    %c0_34 = arith.constant 0 : index
    %20 = vector.load %arg3[%c0_33, %c0_34] : memref<36x128xbf16, #tpu.memory_space<vmem>>, vector<36x128xbf16>
    %cst = arith.constant dense<0.000000e+00> : vector<256x128xf32>
    %21 = tpu.matmul %19, %20, %cst {dimension_numbers = #tpu.dot_dimension_numbers<[1], [0], [0], [1], [0, 0, 1, 1], [], []>} : vector<256x36xbf16>, vector<36x128xbf16>, vector<256x128xf32> -> vector<256x128xf32>
    %c0_35 = arith.constant 0 : index
    %c0_36 = arith.constant 0 : index
    %22 = vector.load %arg4[%c0_35, %c0_36] : memref<1x128xf32, #tpu.memory_space<vmem>>, vector<1x128xf32>
    %23 = vector.broadcast %22 : vector<1x128xf32> to vector<256x128xf32>
    %24 = arith.addf %21, %23 : vector<256x128xf32>
    %cst_37 = arith.constant 0.000000e+00 : f32
    %25 = vector.broadcast %cst_37 : f32 to vector<256x128xf32>
    %26 = arith.maximumf %24, %25 : vector<256x128xf32>
    %c0_38 = arith.constant 0 : index
    %c0_39 = arith.constant 0 : index
    %c0_40 = arith.constant 0 : index
    %27 = vector.load %arg5[%c0_38, %c0_39, %c0_40] : memref<1x256x128xf32, #tpu.memory_space<vmem>>, vector<1x256x128xf32>
    %28 = vector.shape_cast %27 : vector<1x256x128xf32> to vector<256x128xf32>
    %29 = vector.shape_cast %26 : vector<256x128xf32> to vector<1x256x128xf32>
    tpu.vector_store %arg5[%c0_38, %c0_39, %c0_40], %29 {strides = array<i32>} : memref<1x256x128xf32, #tpu.memory_space<vmem>>, vector<1x256x128xf32>,
    return
  }
  func.func @transform_0(%arg0: i32, %arg1: i32) -> (i32, i32, i32, i32) {
    %c0_i32 = arith.constant 0 : i32
    %c0_i32_0 = arith.constant 0 : i32
    %c0_i32_1 = arith.constant 0 : i32
    %c0_i32_2 = arith.constant 0 : i32
    return %arg0, %c0_i32, %c0_i32_0, %c0_i32_1 : i32, i32, i32, i32
  }
  func.func @transform_1(%arg0: i32, %arg1: i32) -> (i32, i32) {
    %c0_i32 = arith.constant 0 : i32
    %c0_i32_0 = arith.constant 0 : i32
    return %c0_i32, %arg1 : i32, i32
  }
  func.func @transform_2(%arg0: i32, %arg1: i32) -> (i32, i32) {
    %c0_i32 = arith.constant 0 : i32
    %c0_i32_0 = arith.constant 0 : i32
    return %c0_i32, %arg1 : i32, i32
  }
  func.func @transform_3(%arg0: i32, %arg1: i32) -> (i32, i32, i32) {
    %c0_i32 = arith.constant 0 : i32
    %c0_i32_0 = arith.constant 0 : i32
    return %arg0, %c0_i32, %arg1 : i32, i32, i32
  }
}

</mosaic_0001>

<bundles_post_ra>
// kernel: tpu_custom_call.1
= control target key start
LH: loop header
LB: loop body
LE: loop exit
PB: predicated region body
PF: predicated region fallthrough
CT: control target
= control target key end

     0   :  { %8 = vsyncpa [#allocation3], 0  ;;  %s4677_s0 = inlined_call_operand.vmem [shape: bf16[2,18,18,4], index: 0, kind: input, shape index: {}]   ;;  %s4678_s1 = inlined_call_operand.vmem [shape: bf16[36,128], index: 1, kind: input, shape index: {}]   ;;  %s4679_s2 = inlined_call_operand.vmem [shape: f32[1,128], index: 2, kind: input, shape index: {}]   ;;  %s4680_s3 = inlined_call_operand.hbm [shape: f32[2,256,128], index: 3, kind: output, shape index: {}]  }
   0x1   :  { %10 = vsyncpa [#allocation3 + $0x1], 0  ;;  %s3276_s12 = smov 0   ;;  %s3278_s13 = smov 0  }
   0x2   :  { %s3280_s14 = smov 0   ;;  %s3282_s15 = smov 0  }
   0x3   :  { %s3284_s16 = smov 0   ;;  %s3286_s17 = smov 0  }
   0x4 LB: > { %s2582_s18 = sadd.s32 4294967295, %s3244_s17   ;;  %s2583_s19 = sadd.s32 4294967294, %s3244_s17   ;;  %s3244_s17 = sphi %s3286_s17, %s16_s17   ;;  %s3240_s16 = sphi %s3284_s16, %s4699_s16   ;;  %s3236_s15 = sphi %s3282_s15, %s4698_s15   ;;  %s3232_s14 = sphi %s3280_s14, %s4697_s14   ;;  %s3228_s13 = sphi %s3278_s13, %s4696_s13   ;;  %s3224_s12 = sphi %s3276_s12, %s4695_s12  }
   0x5   : > { %s28_s20 = sadd.s32 1, %s3240_s16  ;;  %s115_s21 = sadd.s32 1, %s3232_s14 }
   0x6   : > { %p30_p0 = scmp.ge.s32.totalorder %s28_s20, 2  ;;  %p125_p1 = scmp.ne.s32.totalorder %s3232_s14, %s3228_s13 }
   0x7   : > { %p126_p2 = scmp.eq.s32.totalorder %s2582_s18, 1  ;;  %p131_p3 = scmp.ne.s32.totalorder %s3228_s13, %s3224_s12 }
   0x8   : > { %s4701_s20 = smov (%p30_p0, %s28_s20), 0  ;;  %p132_p5 = scmp.eq.s32.totalorder %s2583_s19, 1 }
   0x9   : > { %p3316_p4 = por %p126_p2, %p125_p1  ;;  %s110_s23 = ssub.s32 %s3240_s16, %s4701_s20 }
   0xa   : > { %p2588_p6 = scmp.ge.s32.totalorder %s3244_s17, 1  ;;  %p113_p7 = scmp.eq.s32.totalorder %s110_s23, 0 }
   0xb   : > { %p3323_p8 = por %p132_p5, %p131_p3  ;;  %p171_p9 = scmp.lt.s32.totalorder %s3244_s17, 3 }
   0xc   : > { %s3329_s25 = scalar_select %p113_p7, %s3232_s14, %s115_s21  }
   0xd   : > { %p172_p10 = pnand %p2588_p6, %p171_p9 }
   0xf   : > { %175 = sbr.rel (%p172_p10) target bundleno = 637 (0x27d), region = 32 }
  0x16   : > { %p202_p11 = scmp.lt.s32.totalorder %s3236_s15, 1  ;;  %s3246_s4 = smov 12   ;;  %vm810_vm0 = vcmask 1046528   ;;  %vm537_vm1 = vsmask.f32 7424  ;;  %vm2239_vm2 = vcmask 1041408  }
  0x17   : > { %s3247_s5 = smov 8   ;;  %s3248_s6 = smov 4   ;;  %vm1915_vm3 = vcmask 31744   ;;  %vm1948_vm4 = vcmask 64512   ;;  %vm1981_vm5 = vcmask 97280   ;;  %vm2014_vm6 = vcmask 130048  }
  0x18   : > { %s203_s26 = scalar_select %p202_p11, %s3236_s15, 1  ;;  %vm2047_vm7 = vcmask 162816   ;;  %vm2080_vm8 = vcmask 195584   ;;  %vm2113_vm9 = vcmask 228352   ;;  %vm2146_vm10 = vcmask 261120  }
  0x19   : > { %s3249_s7 = smov 16   ;;  %s3250_s8 = smov 20   ;;  %vm2206_vm11 = vcmask 293888  }
  0x1a   : > { %s2954_s27 = smul.u32 216, %s203_s26  ;;  %s3251_s11 = smov 24  }
  0x1b   : > { %s3252_s21 = smov 28   ;;  %s3253_s23 = smov 32  }
  0x1c   : > { %s3336_s30 = scalar_lea.vmem %s4677_s0, %s2954_s27  ;;  %s199_s28 = sand.u32 1, %s3228_s13  }
  0x1d   : > { %v2607_v0 = vld [vmem:[%s3336_s30 + $0x6c] sm:$0xf]  ;;  %v3340_v1 = vld [vmem:[%s3336_s30 + $0x70] sm:$0xf]  ;;  %v232_v6 = vld [vmem:[%s3336_s30 + $0x64] sm:$0xf] }
  0x1e   : > { %v3343_v2 = vcombine.low %v2607_v0, %v3340_v1  ;;  %v2591_v3 = vld [vmem:[%s3336_s30 + $0xc] sm:$0xf]  ;;  %v3347_v4 = vld [vmem:[%s3336_s30 + $0x10] sm:$0xf]  ;;  %v271_v7 = vld [vmem:[%s3336_s30 + $0x60] sm:$0xe] }
  0x1f   : > { %v3350_v5 = vcombine.low %v2591_v3, %v3347_v4  ;;  %v3357_v8 = vld [vmem:[%s3336_s30 + $0x68] ss:$0 sps:$4 sm:$0x11]   ;;  %v2759_v9 = vcombine.low %v271_v7, %v232_v6  ;;  %v231_v10 = vld [vmem:[%s3336_s30 + $0x60] sm:$0xf]  ;;  %s3254_s19 = smov [#allocation2]  }
  0x20   : > { %987 = vrot.lane.b32.xlu1 %v3343_v2, %s3246_s4  ;;  %v1150_v11 = vshll.u32 %v3343_v2, 16  ;;  %v216_v12 = vld [vmem:[%s3336_s30 + $0x4] sm:$0xf]  ;;  %v836_v14 = vrot.slane %v3357_v8, 1  ;;  %v263_v15 = vld [vmem:[%s3336_s30] sm:$0xe]  ;;  %v3368_v18 = vcombine.low %v231_v10, %v232_v6 }
  0x21   : > { %971 = vrot.lane.b32.xlu0 %v3350_v5, %s3246_s4  ;;  %v835_v13 = vrot.slane %v2759_v9, 1  ;;  %v215_v16 = vld [vmem:[%s3336_s30] sm:$0xf]  ;;  %v1054_v17 = vshll.u32 %v3350_v5, 16  ;;  %v2751_v20 = vcombine.low %v263_v15, %v216_v12  ;;  %v233_v21 = vld [vmem:[%s3336_s30 + $0x6c] sm:$0xf] }
  0x22   : > { %v3026_v19 = vld [vmem:[%s3336_s30 + $0x8] ss:$0 sps:$4 sm:$0x11]   ;;  %v3373_v23 = vcombine.low %v215_v16, %v216_v12  ;;  %v234_v24 = vld [vmem:[%s3336_s30 + $0x70] sm:$0xf]  ;;  %v635_v30 = vshrl.u32 %v3368_v18, 16 }
  0x23   : > { %v837_v22 = vsel %vm810_vm0, %v835_v13, %v836_v14  ;;  %v272_v25 = vld [vmem:[%s3336_s30 + $0x6c] sm:$0xe]  ;;  %v811_v26 = vrot.slane %v2751_v20, 1  ;;  %v812_v27 = vrot.slane %v3026_v19, 1  ;;  %v3380_v31 = vcombine.low %v233_v21, %v234_v24  ;;  %v218_v33 = vld [vmem:[%s3336_s30 + $0x10] sm:$0xf] }
  0x24   : > { %875 = vrot.lane.b32.xlu1 %v837_v22, %s3247_s5  ;;  %v3030_v28 = vld [vmem:[%s3336_s30 + $0x74] ss:$0 sps:$4 sm:$0x11]   ;;  %v2760_v29 = vcombine.low %v272_v25, %v234_v24  ;;  %v217_v32 = vld [vmem:[%s3336_s30 + $0xc] sm:$0xf]  ;;  %v539_v41 = vshrl.u32 %v3373_v23, 16 }
  0x25   : > { %v813_v34 = vsel %vm810_vm0, %v811_v26, %v812_v27  ;;  %v839_v36 = vrot.slane %v3030_v28, 1  ;;  %v264_v37 = vld [vmem:[%s3336_s30 + $0xc] sm:$0xe]  ;;  %v3386_v38 = vcombine.low %v217_v32, %v218_v33  ;;  %v3033_v39 = vld [vmem:[%s3336_s30 + $0x14] ss:$0 sps:$4 sm:$0x11]  }
  0x26   : > { %v838_v35 = vrot.slane %v2760_v29, 1  ;;  %859 = vrot.lane.b32.xlu0 %v813_v34, %s3247_s5  ;;  %v2752_v40 = vcombine.low %v264_v37, %v218_v33  ;;  %v541_v42 = vshll.u32 %v3373_v23, 16  ;;  %v546_v43 = vshll.u32 %v3026_v19, 16  ;;  %v2609_v52 = vld [vmem:[%s3336_s30 + $0x78] sm:$0xf] }
  0x27   : > { %v551_v45 = vshrl.u32 %v3386_v38, 16  ;;  %v553_v46 = vshll.u32 %v3386_v38, 16  ;;  %v647_v47 = vshrl.u32 %v3380_v31, 16  ;;  %v815_v49 = vrot.slane %v3033_v39, 1  ;;  %v3400_v57 = vld [vmem:[%s3336_s30 + $0x7c] sm:$0xf] }
  0x28   : > { %v840_v44 = vsel %vm810_vm0, %v838_v35, %v839_v36  ;;  %v814_v48 = vrot.slane %v2752_v40, 1  ;;  %v558_v50 = vshll.u32 %v3033_v39, 16  ;;  %v543_v51 = vrot.slane %v541_v42, 1  ;;  %v2593_v62 = vld [vmem:[%s3336_s30 + $0x18] sm:$0xf] }
  0x29   : > { %877 = vrot.lane.b32.xlu1 %v840_v44, %s3247_s5  ;;  %v555_v53 = vrot.slane %v553_v46, 1  ;;  %v548_v54 = vrot.slane %v546_v43, 1  ;;  %v649_v55 = vshll.u32 %v3380_v31, 16  ;;  %v654_v56 = vshll.u32 %v3030_v28, 16  ;;  %v3406_v63 = vld [vmem:[%s3336_s30 + $0x1c] sm:$0xf] }
  0x2a   : > { %v816_v58 = vsel %vm810_vm0, %v814_v48, %v815_v49  ;;  %v560_v59 = vrot.slane %v558_v50, 1  ;;  %v544_v60 = vor.u32 %v543_v51, %v539_v41  ;;  %v637_v61 = vshll.u32 %v3368_v18, 16  ;;  %v3413_v13 = vld [vmem:[%s3336_s30 + $0x74] ss:$0 sps:$4 sm:$0x11]  }
  0x2b   : > { %861 = vrot.lane.b32.xlu0 %v816_v58, %s3247_s5  ;;  %v556_v0 = vor.u32 %v555_v53, %v551_v45  ;;  %v651_v3 = vrot.slane %v649_v55, 1  ;;  %v656_v6 = vrot.slane %v654_v56, 1  ;;  %v642_v7 = vshll.u32 %v3357_v8, 16  ;;  %v3418_v20 = vld [vmem:[%s3336_s30 + $0x14] ss:$0 sps:$4 sm:$0x11]  }
  0x2c   : > { %v549_v9 = vsel %vm537_vm1, %v544_v60, %v548_v54  ;;  %v639_v10 = vrot.slane %v637_v61, 1  ;;  %v2776_v12 = vcombine.low %v2609_v52, %v3400_v57  ;;  %v2768_v19 = vcombine.low %v2593_v62, %v3406_v63  ;;  %v3425_v24 = vld [vmem:[%s3336_s30 + $0x80] ss:$0 sps:$4 sm:$0x11]   ;;  %v2647_v40 = vld [vmem:[%s3336_s30 + $0x6c] sm:$0xe] }
  0x2d   : > { %v561_v14 = vsel %vm537_vm1, %v556_v0, %v560_v59  ;;  %v652_v15 = vor.u32 %v651_v3, %v647_v47  ;;  %v644_v16 = vrot.slane %v642_v7, 1  ;;  %v1148_v21 = vshrl.u32 %v3343_v2, 16  ;;  %v2639_v43 = vld [vmem:[%s3336_s30 + $0xc] sm:$0xe]  ;;  %v2648_v49 = vld [vmem:[%s3336_s30 + $0x78] sm:$0xe] }
  0x2e   : > { %732 = vrot.lane.b32.xlu1 %v561_v14, %s3248_s6  ;;  %v640_v8 = vor.u32 %v639_v10, %v635_v30  ;;  %v1152_v22 = vrot.slane %v1150_v11, 1  ;;  %v1162_v26 = vshll.u32 %v2776_v12, 16  ;;  %v1155_v27 = vshll.u32 %v3413_v13, 16  ;;  %v3436_v11 = vld [vmem:[%s3336_s30 + $0x20] ss:$0 sps:$4 sm:$0x11]  }
  0x2f   : > { %730 = vrot.lane.b32.xlu0 %v549_v9, %s3248_s6  ;;  %v657_v25 = vsel %vm537_vm1, %v652_v15, %v656_v6  ;;  %v1052_v28 = vshrl.u32 %v3350_v5, 16  ;;  %v1066_v30 = vshll.u32 %v2768_v19, 16  ;;  %v1056_v32 = vrot.slane %v1054_v17, 1  ;;  %v2640_v53 = vld [vmem:[%s3336_s30 + $0x18] sm:$0xe] }
  0x30   : > { %v645_v29 = vsel %vm537_vm1, %v640_v8, %v644_v16  ;;  %v1059_v2 = vshll.u32 %v3418_v20, 16  ;;  %v1153_v33 = vor.u32 %v1152_v22, %v1148_v21  ;;  %v1157_v34 = vrot.slane %v1155_v27, 1  ;;  %v2671_v54 = vld [vmem:[%s3336_s30 + $0x78] sm:$0xf]  ;;  %v3463_v60 = vld [vmem:[%s3336_s30 + $0x1c] sm:$0xf] }
  0x31   : > { %v1057_v35 = vor.u32 %v1056_v32, %v1052_v28  ;;  %v1160_v36 = vshrl.u32 %v2776_v12, 16  ;;  %v1164_v37 = vrot.slane %v1162_v26, 1  ;;  %v1167_v39 = vshll.u32 %v3425_v24, 16  ;;  %v2655_v55 = vld [vmem:[%s3336_s30 + $0x18] sm:$0xf] }
  0x32   : > { %748 = vrot.lane.b32.xlu1 %v657_v25, %s3248_s6  ;;  %v1061_v5 = vrot.slane %v1059_v2, 1  ;;  %v1064_v17 = vshrl.u32 %v2768_v19, 16  ;;  %v1068_v41 = vrot.slane %v1066_v30, 1  ;;  %v1071_v42 = vshll.u32 %v3436_v11, 16  ;;  %v2673_v7 = vld [vmem:[%s3336_s30 + $0x84] sm:$0xf] }
  0x33   : > { %746 = vrot.lane.b32.xlu0 %v645_v29, %s3248_s6  ;;  %v2807_v44 = vcombine.low %v2647_v40, %v3340_v1  ;;  %v1158_v45 = vsel %vm537_vm1, %v1153_v33, %v1157_v34  ;;  %v1165_v46 = vor.u32 %v1164_v37, %v1160_v36  ;;  %v1169_v47 = vrot.slane %v1167_v39, 1  ;;  %v3455_v1 = vld [vmem:[%s3336_s30 + $0x7c] sm:$0xf]  ;;  %v3473_v9 = vld [vmem:[%s3336_s30 + $0x88] sm:$0xf] }
  0x34   : > { %v2799_v48 = vcombine.low %v2639_v43, %v3347_v4  ;;  %v1062_v50 = vsel %vm537_vm1, %v1057_v35, %v1061_v5  ;;  %v1069_v51 = vor.u32 %v1068_v41, %v1064_v17  ;;  %v1073_v52 = vrot.slane %v1071_v42, 1  ;;  %v3480_v14 = vld [vmem:[%s3336_s30 + $0x28] sm:$0xf]  ;;  %v3486_v21 = vld [vmem:[%s3336_s30 + $0x80] ss:$0 sps:$4 sm:$0x11]  }
  0x35   : > { %v2808_v56 = vcombine.low %v2648_v49, %v3400_v57  ;;  %v1170_v4 = vsel %vm537_vm1, %v1165_v46, %v1169_v47  ;;  %v1347_v58 = vrot.slane %v2807_v44, 1  ;;  %v1348_v59 = vrot.slane %v3413_v13, 1  ;;  %v2657_v13 = vld [vmem:[%s3336_s30 + $0x24] sm:$0xf]  ;;  %v235_v37 = vld [vmem:[%s3336_s30 + $0x78] sm:$0xf] }
  0x36   : > { %989 = vrot.lane.b32.xlu1 %v2776_v12, %s3246_s4  ;;  %v2800_v61 = vcombine.low %v2640_v53, %v3406_v63  ;;  %v1074_v62 = vsel %vm537_vm1, %v1069_v51, %v1073_v52  ;;  %v1323_v0 = vrot.slane %v2799_v48, 1  ;;  %v1324_v3 = vrot.slane %v3418_v20, 1  ;;  %v3493_v26 = vld [vmem:[%s3336_s30 + $0x20] ss:$0 sps:$4 sm:$0x11]  }
  0x37   : > { %973 = vrot.lane.b32.xlu0 %v2768_v19, %s3246_s4  ;;  %v2823_v57 = vcombine.low %v2671_v54, %v3455_v1  ;;  %v2815_v6 = vcombine.low %v2655_v55, %v3463_v60  ;;  %v1349_v10 = vsel %vm810_vm0, %v1347_v58, %v1348_v59  ;;  %v1350_v63 = vrot.slane %v2808_v56, 1  ;;  %v3499_v34 = vld [vmem:[%s3336_s30 + $0x8c] ss:$0 sps:$4 sm:$0x11]   ;;  %v3508_v39 = vld [vmem:[%s3336_s30 + $0x7c] sm:$0xf] }
  0x38   : > { %v1351_v12 = vrot.slane %v3425_v24, 1  ;;  %v1325_v15 = vsel %vm810_vm0, %v1323_v0, %v1324_v3  ;;  %v1326_v16 = vrot.slane %v2800_v61, 1  ;;  %v1327_v19 = vrot.slane %v3436_v11, 1  ;;  %v3504_v36 = vld [vmem:[%s3336_s30 + $0x2c] ss:$0 sps:$4 sm:$0x11]  }
  0x39   : > { %v1662_v20 = vshll.u32 %v2823_v57, 16  ;;  %v2824_v8 = vcombine.low %v2673_v7, %v3473_v9  ;;  %v1566_v22 = vshll.u32 %v2815_v6, 16  ;;  %v2816_v24 = vcombine.low %v2657_v13, %v3480_v14  ;;  %v219_v40 = vld [vmem:[%s3336_s30 + $0x18] sm:$0xf]  ;;  %v3512_v17 = vld [vmem:[%s3336_s30 + $0x1c] sm:$0xf] }
  0x3a   : > { %1259 = vrot.lane.b32.xlu1 %v1158_v45, %s3249_s7  ;;  %v1352_v25 = vsel %vm810_vm0, %v1350_v63, %v1351_v12  ;;  %v1328_v27 = vsel %vm810_vm0, %v1326_v16, %v1327_v19  ;;  %v1660_v29 = vshrl.u32 %v2823_v57, 16  ;;  %v1667_v32 = vshll.u32 %v3486_v21, 16  ;;  %v3115_v41 = vld [vmem:[%s4678_s1] sm:$0xff]   ;;  %v2711_v42 = vld [vmem:[%s3336_s30 + $0x78] sm:$0xe]  ;;  %v3120_v56 = vld [vmem:[%s4678_s1 + $0x8] sm:$0xff]  }
  0x3b   : > { %1243 = vrot.lane.b32.xlu0 %v1062_v50, %s3249_s7  ;;  %v1674_v28 = vshll.u32 %v2824_v8, 16  ;;  %v1664_v30 = vrot.slane %v1662_v20, 1  ;;  %v1578_v2 = vshll.u32 %v2816_v24, 16  ;;  %v1564_v11 = vshrl.u32 %v2815_v6, 16  ;;  %v2703_v47 = vld [vmem:[%s3336_s30 + $0x18] sm:$0xe]  ;;  %2908 = vmatprep.subr.bf16.mxu0 %v3115_v41 }
  0x3c   : > { %v1568_v33 = vrot.slane %v1566_v22, 1  ;;  %v1571_v35 = vshll.u32 %v3493_v26, 16  ;;  %v1669_v43 = vrot.slane %v1667_v32, 1  ;;  %v1672_v44 = vshrl.u32 %v2824_v8, 16  ;;  %2946 = vmatprep.subr.bf16.mxu1 %v3115_v41  ;;  %2909 = vmatpush3.bf16.msra.mxu0 %v3115_v41  ;;  %v237_v7 = vld [vmem:[%s3336_s30 + $0x84] sm:$0xf] }
  0x3d   : > { %v1665_v5 = vor.u32 %v1664_v30, %v1660_v29  ;;  %v1676_v45 = vrot.slane %v1674_v28, 1  ;;  %v1679_v46 = vshll.u32 %v3499_v34, 16  ;;  %v1576_v48 = vshrl.u32 %v2816_v24, 16  ;;  %2949 = vmatpush3.bf16.msra.mxu1 %v3115_v41  ;;  %v3536_v61 = vld [vmem:[%s3336_s30 + $0x80] ss:$0 sps:$4 sm:$0x11]   ;;  %2910 = vmatprep.subr.bf16.mxu0 %v3120_v56 }
  0x3e   : > { %1261 = vrot.lane.b32.xlu1 %v1170_v4, %s3249_s7  ;;  %v1580_v49 = vrot.slane %v1578_v2, 1  ;;  %v1583_v50 = vshll.u32 %v3504_v36, 16  ;;  %v3524_v51 = vcombine.low %v235_v37, %v3508_v39  ;;  %v1569_v52 = vor.u32 %v1568_v33, %v1564_v11  ;;  %2947 = vmatprep.subr.bf16.mxu1 %v3120_v56  ;;  %v221_v13 = vld [vmem:[%s3336_s30 + $0x24] sm:$0xf] }
  0x3f   : > { %1245 = vrot.lane.b32.xlu0 %v1074_v62, %s3249_s7  ;;  %v1573_v53 = vrot.slane %v1571_v35, 1  ;;  %v3527_v54 = vcombine.low %v219_v40, %v3512_v17  ;;  %v2855_v55 = vcombine.low %v2711_v42, %v3455_v1  ;;  %v2847_v4 = vcombine.low %v2703_v47, %v3463_v60  ;;  %v2712_v16 = vld [vmem:[%s3336_s30 + $0x84] sm:$0xe]  ;;  %v3578_v40 = vld [vmem:[%s3336_s30 + $0x8c] ss:$0 sps:$4 sm:$0x11]  }
  0x40   : > { %v1677_v58 = vor.u32 %v1676_v45, %v1672_v44  ;;  %v1681_v59 = vrot.slane %v1679_v46, 1  ;;  %v1670_v1 = vsel %vm537_vm1, %v1665_v5, %v1669_v43  ;;  %v1581_v62 = vor.u32 %v1580_v49, %v1576_v48  ;;  %2911 = vmatpush3.bf16.msra.mxu0 %v3120_v56 }
  0x41   : > { %v1585_v0 = vrot.slane %v1583_v50, 1  ;;  %v661_v3 = vshll.u32 %v3524_v51, 16  ;;  %v1574_v60 = vsel %vm537_vm1, %v1569_v52, %v1573_v53  ;;  %v1859_v63 = vrot.slane %v2855_v55, 1  ;;  %2950 = vmatpush3.bf16.msra.mxu1 %v3120_v56  ;;  %v273_v53 = vld [vmem:[%s3336_s30 + $0x78] sm:$0xe] }
  0x42   : > { %1387 = vrot.lane.b32.xlu1 %v1349_v10, %s3250_s8  ;;  %v3548_v10 = vld [vmem:[%s3336_s30 + $0x88] sm:$0xf]  ;;  %v1860_v12 = vrot.slane %v3486_v21, 1  ;;  %v1682_v19 = vsel %vm537_vm1, %v1677_v58, %v1681_v59  ;;  %v1835_v20 = vrot.slane %v2847_v4, 1  ;;  %v666_v22 = vshll.u32 %v3536_v61, 16 }
  0x43   : > { %1371 = vrot.lane.b32.xlu0 %v1325_v15, %s3250_s8  ;;  %v3553_v15 = vld [vmem:[%s3336_s30 + $0x28] sm:$0xf]  ;;  %v1586_v21 = vsel %vm537_vm1, %v1581_v62, %v1585_v0  ;;  %v3565_v28 = vcombine.low %v237_v7, %v3548_v10  ;;  %v563_v29 = vshrl.u32 %v3527_v54, 16  ;;  %v2856_v2 = vcombine.low %v2712_v16, %v3473_v9  ;;  %v3583_v9 = vld [vmem:[%s3336_s30 + $0x2c] ss:$0 sps:$4 sm:$0x11]  }
  0x44   : > { %v3570_v32 = vcombine.low %v221_v13, %v3553_v15  ;;  %v668_v33 = vrot.slane %v666_v22, 1  ;;  %v1861_v35 = vsel %vm810_vm0, %v1859_v63, %v1860_v12  ;;  %v1863_v45 = vrot.slane %v3499_v34, 1  ;;  %v266_v63 = vld [vmem:[%s3336_s30 + $0x24] sm:$0xe] }
  0x45   : > { %v673_v5 = vshll.u32 %v3565_v28, 16  ;;  %v1862_v44 = vrot.slane %v2856_v2, 1  ;;  %v1839_v47 = vrot.slane %v3504_v36, 1  ;;  %v671_v49 = vshrl.u32 %v3565_v28, 16  ;;  %v265_v36 = vld [vmem:[%s3336_s30 + $0x18] sm:$0xe] }
  0x46   : > { %1389 = vrot.lane.b32.xlu1 %v1352_v25, %s3250_s8  ;;  %v659_v25 = vshrl.u32 %v3524_v51, 16  ;;  %v678_v52 = vshll.u32 %v3578_v40, 16  ;;  %v575_v56 = vshrl.u32 %v3570_v32, 16  ;;  %v582_v4 = vshll.u32 %v3583_v9, 16 }
  0x47   : > { %1373 = vrot.lane.b32.xlu0 %v1328_v27, %s3250_s8  ;;  %v663_v27 = vrot.slane %v661_v3, 1  ;;  %v675_v50 = vrot.slane %v673_v5, 1  ;;  %v1864_v58 = vsel %vm810_vm0, %v1862_v44, %v1863_v45  ;;  %v2761_v62 = vcombine.low %v273_v53, %v3508_v39  ;;  %v274_v3 = vld [vmem:[%s3336_s30 + $0x84] sm:$0xe] }
  0x48   : > { %v2753_v0 = vcombine.low %v265_v36, %v3512_v17  ;;  %v584_v7 = vrot.slane %v582_v4, 1  ;;  %v842_v12 = vrot.slane %v3536_v61, 1  ;;  %v2762_v16 = vcombine.low %v274_v3, %v3548_v10 }
  0x49   : > { %v664_v37 = vor.u32 %v663_v27, %v659_v25  ;;  %v676_v59 = vor.u32 %v675_v50, %v671_v49  ;;  %v841_v17 = vrot.slane %v2761_v62, 1  ;;  %v2754_v61 = vcombine.low %v266_v63, %v3553_v15  ;;  %v3630_v15 = vld [vmem:[%s3336_s30 + $0x94] sm:$0xf]  ;;  %v2641_v62 = vld [vmem:[%s3336_s30 + $0x24] sm:$0xe] }
  0x4a   : > { %1499 = vrot.lane.b32.xlu1 %v2823_v57, %s3251_s11  ;;  %v3542_v57 = vld [vmem:[%s3336_s30 + $0x20] ss:$0 sps:$4 sm:$0x11]   ;;  %v844_v10 = vrot.slane %v2762_v16, 1 }
  0x4b   : > { %1483 = vrot.lane.b32.xlu0 %v2815_v6, %s3251_s11  ;;  %v565_v6 = vshll.u32 %v3527_v54, 16  ;;  %v669_v48 = vsel %vm537_vm1, %v664_v37, %v668_v33  ;;  %v818_v13 = vrot.slane %v3542_v57, 1  ;;  %v843_v27 = vsel %vm810_vm0, %v841_v17, %v842_v12  ;;  %v2597_v33 = vld [vmem:[%s3336_s30 + $0x30] sm:$0xf] }
  0x4c   : > { %v820_v2 = vrot.slane %v2754_v61, 1  ;;  %v2650_v12 = vld [vmem:[%s3336_s30 + $0x90] sm:$0xe] }
  0x4d   : > { %v567_v30 = vrot.slane %v565_v6, 1  ;;  %v2810_v61 = vcombine.low %v2650_v12, %v3630_v15 }
  0x4e   : > { %1501 = vrot.lane.b32.xlu1 %v2824_v8, %s3251_s11  ;;  %v1836_v8 = vrot.slane %v3493_v26, 1  ;;  %v570_v26 = vshll.u32 %v3542_v57, 16  ;;  %v2595_v57 = vld [vmem:[%s3336_s30 + $0x24] sm:$0xf] }
  0x4f   : > { %1485 = vrot.lane.b32.xlu0 %v2816_v24, %s3251_s11  ;;  %v2704_v24 = vld [vmem:[%s3336_s30 + $0x24] sm:$0xe]  ;;  %v568_v42 = vor.u32 %v567_v30, %v563_v29  ;;  %v2613_v30 = vld [vmem:[%s3336_s30 + $0x90] sm:$0xf] }
  0x50   : > { %v2848_v11 = vcombine.low %v2704_v24, %v3480_v14  ;;  %v1837_v41 = vsel %vm810_vm0, %v1835_v20, %v1836_v8  ;;  %v572_v43 = vrot.slane %v570_v26, 1  ;;  %v577_v14 = vshll.u32 %v3570_v32, 16  ;;  %v2611_v20 = vld [vmem:[%s3336_s30 + $0x84] sm:$0xf]  ;;  %v3614_v8 = vld [vmem:[%s3336_s30 + $0x88] sm:$0xf] }
  0x51   : > { %v3620_v24 = vld [vmem:[%s3336_s30 + $0x28] sm:$0xf]  ;;  %v2777_v25 = vcombine.low %v2611_v20, %v3614_v8 }
  0x52   : > { %1771 = vrot.lane.b32.xlu1 %v1670_v1, %s3252_s21  ;;  %v1838_v46 = vrot.slane %v2848_v11, 1  ;;  %v573_v55 = vsel %vm537_vm1, %v568_v42, %v572_v43  ;;  %v579_v34 = vrot.slane %v577_v14, 1  ;;  %v680_v1 = vrot.slane %v678_v52, 1  ;;  %v3075_v43 = vld [vmem:[%s3336_s30 + $0x8c] ss:$0 sps:$4 sm:$0x11]  }
  0x53   : > { %1755 = vrot.lane.b32.xlu0 %v1574_v60, %s3252_s21  ;;  %v2769_v29 = vcombine.low %v2595_v57, %v3620_v24  ;;  %v821_v11 = vrot.slane %v3583_v9, 1  ;;  %v1174_v37 = vshll.u32 %v2777_v25, 16  ;;  %v3646_v14 = vld [vmem:[%s3336_s30 + $0x2c] ss:$0 sps:$4 sm:$0x11]   ;;  %v1172_v45 = vshrl.u32 %v2777_v25, 16 }
  0x54   : > { %v1840_v60 = vsel %vm810_vm0, %v1838_v46, %v1839_v47  ;;  %v580_v6 = vor.u32 %v579_v34, %v575_v56  ;;  %v681_v39 = vsel %vm537_vm1, %v676_v59, %v680_v1  ;;  %v1179_v49 = vshll.u32 %v3075_v43, 16  ;;  %v3651_v52 = vld [vmem:[%s3336_s30 + $0x98] ss:$0 sps:$4 sm:$0x11]   ;;  %v2649_v56 = vld [vmem:[%s3336_s30 + $0x84] sm:$0xe] }
  0x55   : > { %v822_v9 = vsel %vm810_vm0, %v820_v2, %v821_v11  ;;  %v1176_v46 = vrot.slane %v1174_v37, 1  ;;  %v1076_v47 = vshrl.u32 %v2769_v29, 16  ;;  %v1083_v53 = vshll.u32 %v3646_v14, 16  ;;  %v2675_v57 = vld [vmem:[%s3336_s30 + $0x90] sm:$0xf] }
  0x56   : > { %1773 = vrot.lane.b32.xlu1 %v1682_v19, %s3252_s21  ;;  %v817_v19 = vrot.slane %v2753_v0, 1  ;;  %v585_v22 = vsel %vm537_vm1, %v580_v6, %v584_v7  ;;  %v1181_v36 = vrot.slane %v1179_v49, 1  ;;  %v1191_v1 = vshll.u32 %v3651_v52, 16  ;;  %v2677_v11 = vld [vmem:[%s3336_s30 + $0x9c] sm:$0xf] }
  0x57   : > { %1757 = vrot.lane.b32.xlu0 %v1586_v21, %s3252_s21  ;;  %v845_v21 = vrot.slane %v3578_v40, 1  ;;  %v2778_v40 = vcombine.low %v2613_v30, %v3630_v15  ;;  %v1177_v34 = vor.u32 %v1176_v46, %v1172_v45  ;;  %v1085_v0 = vrot.slane %v1083_v53, 1  ;;  %v3684_v15 = vld [vmem:[%s3336_s30 + $0x34] sm:$0xf]  ;;  %v3701_v45 = vld [vmem:[%s3336_s30 + $0x40] sm:$0xf] }
  0x58   : > { %v819_v26 = vsel %vm810_vm0, %v817_v19, %v818_v13  ;;  %v2809_v7 = vcombine.low %v2649_v56, %v3614_v8  ;;  %v2801_v63 = vcombine.low %v2641_v62, %v3620_v24  ;;  %v3675_v24 = vld [vmem:[%s3336_s30 + $0x94] sm:$0xf]  ;;  %v3704_v46 = vld [vmem:[%s3336_s30 + $0x98] ss:$0 sps:$4 sm:$0x11]  }
  0x59   : > { %v846_v5 = vsel %vm810_vm0, %v844_v10, %v845_v21  ;;  %v1186_v44 = vshll.u32 %v2778_v40, 16  ;;  %v1184_v4 = vshrl.u32 %v2778_v40, 16  ;;  %v1182_v13 = vsel %vm537_vm1, %v1177_v34, %v1181_v36  ;;  %v3710_v49 = vld [vmem:[%s3336_s30 + $0x38] ss:$0 sps:$4 sm:$0x11]  }
  0x5a   : > { %1899 = vrot.lane.b32.xlu1 %v1861_v35, %s3253_s23  ;;  %v3636_v35 = vld [vmem:[%s3336_s30 + $0x34] sm:$0xf]  ;;  %v1353_v8 = vrot.slane %v2809_v7, 1  ;;  %v1354_v21 = vrot.slane %v3075_v43, 1  ;;  %v2825_v2 = vcombine.low %v2675_v57, %v3675_v24  ;;  %v1595_v62 = vshll.u32 %v3710_v49, 16 }
  0x5b   : > { %1883 = vrot.lane.b32.xlu0 %v1837_v41, %s3253_s23  ;;  %v1078_v41 = vshll.u32 %v2769_v29, 16  ;;  %v2770_v42 = vcombine.low %v2597_v33, %v3636_v35  ;;  %v1188_v59 = vrot.slane %v1186_v44, 1  ;;  %v3689_v33 = vld [vmem:[%s3336_s30 + $0xa0] sm:$0xf] }
  0x5c   : > { %v1355_v37 = vsel %vm810_vm0, %v1353_v8, %v1354_v21  ;;  %v1686_v44 = vshll.u32 %v2825_v2, 16  ;;  %v1684_v56 = vshrl.u32 %v2825_v2, 16  ;;  %v1597_v8 = vrot.slane %v1595_v62, 1 }
  0x5d   : > { %v1080_v50 = vrot.slane %v1078_v41, 1  ;;  %v1088_v3 = vshrl.u32 %v2770_v42, 16  ;;  %v1189_v16 = vor.u32 %v1188_v59, %v1184_v4  ;;  %v1691_v4 = vshll.u32 %v3704_v46, 16  ;;  %v3721_v59 = vld [vmem:[%s3336_s30 + $0x44] ss:$0 sps:$4 sm:$0x11]  }
  0x5e   : > { %750 = vrot.lane.b32.xlu1 %v669_v48, %s3248_s6  ;;  %v1090_v48 = vshll.u32 %v2770_v42, 16  ;;  %v1688_v34 = vrot.slane %v1686_v44, 1  ;;  %v2714_v44 = vld [vmem:[%s3336_s30 + $0x9c] sm:$0xe] }
  0x5f   : > { %734 = vrot.lane.b32.xlu0 %v573_v55, %s3248_s6  ;;  %v3655_v55 = vld [vmem:[%s3336_s30 + $0x38] ss:$0 sps:$4 sm:$0x11]  }
  0x60   : > { %v1095_v6 = vshll.u32 %v3655_v55, 16  ;;  %v1333_v43 = vrot.slane %v3655_v55, 1  ;;  %v2713_v55 = vld [vmem:[%s3336_s30 + $0x90] sm:$0xe] }
  0x61   : > { %v2857_v7 = vcombine.low %v2713_v55, %v3675_v24  ;;  %v1842_v55 = vrot.slane %v3710_v49, 1 }
  0x62   : > { %1901 = vrot.lane.b32.xlu1 %v1864_v58, %s3253_s23  ;;  %v1081_v58 = vor.u32 %v1080_v50, %v1076_v47  ;;  %v1097_v20 = vrot.slane %v1095_v6, 1  ;;  %v3125_v6 = vld [vmem:[%s4678_s1 + $0x10] ss:$0 sps:$4 sm:$0x33]  }
  0x63   : > { %1885 = vrot.lane.b32.xlu0 %v1840_v60, %s3253_s23  ;;  %v1092_v60 = vrot.slane %v1090_v48, 1  ;;  %2952 = vmatprep.subr.msk.bf16.mxu0 %vm2239_vm2, %v3125_v6 }
  0x64   : > { %v1086_v17 = vsel %vm537_vm1, %v1081_v58, %v1085_v0  ;;  %v3718_v58 = vld [vmem:[%s3336_s30 + $0xa4] ss:$0 sps:$4 sm:$0x11]   ;;  %v239_v0 = vld [vmem:[%s3336_s30 + $0x90] sm:$0xf]  ;;  %2953 = vmatprep.subr.msk.bf16.mxu1 %vm2239_vm2, %v3125_v6 }
  0x65   : > { %v1093_v19 = vor.u32 %v1092_v60, %v1088_v3  ;;  %v3727_v60 = vld [vmem:[%s3336_s30 + $0x94] sm:$0xf] }
  0x66   : > { %752 = vrot.lane.b32.xlu1 %v681_v39, %s3248_s6  ;;  %v1193_v39 = vrot.slane %v1191_v1, 1  ;;  %v3742_v57 = vcombine.low %v239_v0, %v3727_v60 }
  0x67   : > { %736 = vrot.lane.b32.xlu0 %v585_v22, %s3248_s6  ;;  %v2642_v22 = vld [vmem:[%s3336_s30 + $0x30] sm:$0xe]  ;;  %v1098_v30 = vsel %vm537_vm1, %v1093_v19, %v1097_v20  ;;  %v1703_v19 = vshll.u32 %v3718_v58, 16 }
  0x68   : > { %v1194_v10 = vsel %vm537_vm1, %v1189_v16, %v1193_v39  ;;  %v3735_v16 = vld [vmem:[%s3336_s30 + $0x34] sm:$0xf]  ;;  %v1693_v39 = vrot.slane %v1691_v4, 1  ;;  %v2705_v20 = vld [vmem:[%s3336_s30 + $0x30] sm:$0xe]  ;;  %4687 = vst [vmem:[#allocation5_spill] sm:$0xff] %v3742_v57 }
  0x6a   : > { %879 = vrot.lane.b32.xlu1 %v843_v27, %s3247_s5  ;;  %v1330_v27 = vrot.slane %v3646_v14, 1  ;;  %v2661_v14 = vld [vmem:[%s3336_s30 + $0x3c] sm:$0xf] }
  0x6b   : > { %863 = vrot.lane.b32.xlu0 %v819_v26, %s3247_s5  ;;  %v2659_v26 = vld [vmem:[%s3336_s30 + $0x30] sm:$0xf]  ;;  %v2818_v53 = vcombine.low %v2661_v14, %v3701_v45  ;;  %v3766_v14 = vld [vmem:[%s3336_s30 + $0xa0] sm:$0xf] }
  0x6d   : > { %v1602_v3 = vshll.u32 %v2818_v53, 16 }
  0x6e   : > { %881 = vrot.lane.b32.xlu1 %v846_v5, %s3247_s5  ;;  %v2817_v5 = vcombine.low %v2659_v26, %v3684_v15  ;;  %v3751_v26 = vld [vmem:[%s3336_s30 + $0x98] ss:$0 sps:$4 sm:$0x11]  }
  0x6f   : > { %865 = vrot.lane.b32.xlu0 %v822_v9, %s3247_s5  ;;  %v2826_v9 = vcombine.low %v2677_v11, %v3689_v33  ;;  %v1604_v24 = vrot.slane %v1602_v3, 1  ;;  %v1865_v11 = vrot.slane %v2857_v7, 1  ;;  %v690_v4 = vshll.u32 %v3751_v26, 16 }
  0x70   : > { %v1590_v48 = vshll.u32 %v2817_v5, 16  ;;  %v1588_v36 = vshrl.u32 %v2817_v5, 16  ;;  %v2858_v7 = vcombine.low %v2714_v44, %v3689_v33 }
  0x71   : > { %v1696_v12 = vshrl.u32 %v2826_v9, 16 }
  0x72   : > { %991 = vrot.lane.b32.xlu1 %v2777_v25, %s3246_s4  ;;  %v1329_v25 = vrot.slane %v2801_v63, 1  ;;  %v1592_v1 = vrot.slane %v1590_v48, 1  ;;  %v1689_v63 = vor.u32 %v1688_v34, %v1684_v56  ;;  %v3771_v48 = vld [vmem:[%s3336_s30 + $0x40] sm:$0xf]  ;;  %v683_v56 = vshrl.u32 %v3742_v57, 16 }
  0x73   : > { %975 = vrot.lane.b32.xlu0 %v2769_v29, %s3246_s4  ;;  %v2802_v29 = vcombine.low %v2642_v22, %v3636_v35  ;;  %v1356_v35 = vrot.slane %v2810_v61, 1  ;;  %v1600_v61 = vshrl.u32 %v2818_v53, 16 }
  0x74   : > { %v1331_v41 = vsel %vm810_vm0, %v1329_v25, %v1330_v27  ;;  %v1593_v22 = vor.u32 %v1592_v1, %v1588_v36  ;;  %v2241_v25 = vsel %vm2239_vm2, %v3125_v6, 0  ;;  %v2849_v27 = vcombine.low %v2705_v20, %v3684_v15 }
  0x75   : > { %2913 = vmatpush3.bf16.msra.mxu0 %v2241_v25  ;;  %2951 = vmatpush3.bf16.msra.mxu1 %v2241_v25  ;;  %v685_v15 = vshll.u32 %v3742_v57, 16  ;;  %v1869_v25 = vrot.slane %v3718_v58, 1 }
  0x76   : > { %993 = vrot.lane.b32.xlu1 %v2778_v40, %s3246_s4  ;;  %v1357_v40 = vrot.slane %v3651_v52, 1  ;;  %v1698_v52 = vshll.u32 %v2826_v9, 16 }
  0x77   : > { %977 = vrot.lane.b32.xlu0 %v2770_v42, %s3246_s4  ;;  %v1332_v42 = vrot.slane %v2802_v29, 1  ;;  %v687_v34 = vrot.slane %v685_v15, 1  ;;  %v275_v15 = vld [vmem:[%s3336_s30 + $0x90] sm:$0xe] }
  0x78   : > { %v1358_v47 = vsel %vm810_vm0, %v1356_v35, %v1357_v40  ;;  %v3758_v35 = vld [vmem:[%s3336_s30 + $0x38] ss:$0 sps:$4 sm:$0x11]   ;;  %v1598_v40 = vsel %vm537_vm1, %v1593_v22, %v1597_v8 }
  0x79   : > { %v1334_v50 = vsel %vm810_vm0, %v1332_v42, %v1333_v43  ;;  %v594_v36 = vshll.u32 %v3758_v35, 16 }
  0x7a   : > { %1263 = vrot.lane.b32.xlu1 %v1182_v13, %s3249_s7  ;;  %v223_v13 = vld [vmem:[%s3336_s30 + $0x30] sm:$0xf] }
  0x7b   : > { %1247 = vrot.lane.b32.xlu0 %v1086_v17, %s3249_s7  ;;  %v1700_v17 = vrot.slane %v1698_v52, 1  ;;  %v3746_v21 = vcombine.low %v223_v13, %v3735_v16  ;;  %v688_v13 = vor.u32 %v687_v34, %v683_v56 }
  0x7d   : > { %4688 = vst [vmem:[#allocation6_spill] sm:$0xff] %v3746_v21  ;;  %v1701_v29 = vor.u32 %v1700_v17, %v1696_v12  ;;  %v589_v43 = vshll.u32 %v3746_v21, 16  ;;  %v587_v0 = vshrl.u32 %v3746_v21, 16  ;;  %v596_v17 = vrot.slane %v594_v36, 1 }
  0x7e   : > { %1265 = vrot.lane.b32.xlu1 %v1194_v10, %s3249_s7  ;;  %v1607_v10 = vshll.u32 %v3721_v59, 16 }
  0x7f   : > { %1249 = vrot.lane.b32.xlu0 %v1098_v30, %s3249_s7  ;;  %v1705_v30 = vrot.slane %v1703_v19, 1  ;;  %v591_v3 = vrot.slane %v589_v43, 1  ;;  %v3799_v19 = vld [vmem:[%s3336_s30 + $0xa4] ss:$0 sps:$4 sm:$0x11]  }
  0x80   : > { %v1609_v42 = vrot.slane %v1607_v10, 1  ;;  %v1868_v10 = vrot.slane %v2858_v7, 1  ;;  %v267_v43 = vld [vmem:[%s3336_s30 + $0x30] sm:$0xe] }
  0x81   : > { %v1706_v52 = vsel %vm537_vm1, %v1701_v29, %v1705_v30  ;;  %v592_v8 = vor.u32 %v591_v3, %v587_v0  ;;  %v1845_v29 = vrot.slane %v3721_v59, 1  ;;  %v2755_v34 = vcombine.low %v267_v43, %v3735_v16  ;;  %v2615_v3 = vld [vmem:[%s3336_s30 + $0x9c] sm:$0xf] }
  0x82   : > { %1391 = vrot.lane.b32.xlu1 %v1355_v37, %s3250_s8  ;;  %v1866_v37 = vrot.slane %v3704_v46, 1  ;;  %v2706_v46 = vld [vmem:[%s3336_s30 + $0x3c] sm:$0xe]  ;;  %v1870_v44 = vsel %vm810_vm0, %v1868_v10, %v1869_v25  ;;  %v848_v0 = vrot.slane %v3751_v26, 1  ;;  %v2617_v25 = vld [vmem:[%s3336_s30 + $0xa8] sm:$0xf] }
  0x83   : > { %1375 = vrot.lane.b32.xlu0 %v1331_v41, %s3250_s8  ;;  %v1605_v41 = vor.u32 %v1604_v24, %v1600_v61 }
  0x84   : > { %v1867_v12 = vsel %vm810_vm0, %v1865_v11, %v1866_v37  ;;  %v702_v37 = vshll.u32 %v3799_v19, 16 }
  0x85   : > { %v1610_v62 = vsel %vm537_vm1, %v1605_v41, %v1609_v42 }
  0x86   : > { %1393 = vrot.lane.b32.xlu1 %v1358_v47, %s3250_s8  ;;  %v225_v47 = vld [vmem:[%s3336_s30 + $0x3c] sm:$0xf] }
  0x87   : > { %1377 = vrot.lane.b32.xlu0 %v1334_v50, %s3250_s8  ;;  %v3789_v49 = vcombine.low %v225_v47, %v3771_v48 }
  0x89   : > { %4690 = vst [vmem:[#allocation8_spill] sm:$0xff] %v3789_v49  ;;  %v601_v61 = vshll.u32 %v3789_v49, 16  ;;  %v599_v41 = vshrl.u32 %v3789_v49, 16 }
  0x8a   : > { %1503 = vrot.lane.b32.xlu1 %v2825_v2, %s3251_s11  ;;  %v1694_v2 = vsel %vm537_vm1, %v1689_v63, %v1693_v39  ;;  %v2850_v63 = vcombine.low %v2706_v46, %v3701_v45  ;;  %v692_v39 = vrot.slane %v690_v4, 1  ;;  %v3806_v45 = vld [vmem:[%s3336_s30 + $0x44] ss:$0 sps:$4 sm:$0x11]   ;;  %v704_v46 = vrot.slane %v702_v37, 1 }
  0x8b   : > { %1487 = vrot.lane.b32.xlu0 %v2817_v5, %s3251_s11  ;;  %v603_v42 = vrot.slane %v601_v61, 1  ;;  %v606_v58 = vshll.u32 %v3806_v45, 16  ;;  %v276_v4 = vld [vmem:[%s3336_s30 + $0x9c] sm:$0xe] }
  0x8c   : > { %v693_v30 = vsel %vm537_vm1, %v688_v13, %v692_v39  ;;  %v823_v39 = vrot.slane %v2755_v34, 1 }
  0x8d   : > { %v608_v56 = vrot.slane %v606_v58, 1 }
  0x8e   : > { %1505 = vrot.lane.b32.xlu1 %v2826_v9, %s3251_s11  ;;  %v241_v9 = vld [vmem:[%s3336_s30 + $0x9c] sm:$0xf] }
  0x8f   : > { %1489 = vrot.lane.b32.xlu0 %v2818_v53, %s3251_s11  ;;  %v1841_v53 = vrot.slane %v2849_v27, 1  ;;  %v3784_v1 = vcombine.low %v241_v9, %v3766_v14  ;;  %v1844_v27 = vrot.slane %v2850_v63, 1  ;;  %v2763_v9 = vcombine.low %v275_v15, %v3727_v60  ;;  %v268_v60 = vld [vmem:[%s3336_s30 + $0x3c] sm:$0xe]  ;;  %v2601_v15 = vld [vmem:[%s3336_s30 + $0x48] sm:$0xf] }
  0x90   : > { %v2764_v63 = vcombine.low %v276_v4, %v3766_v14  ;;  %v2756_v26 = vcombine.low %v268_v60, %v3771_v48 }
  0x91   : > { %4689 = vst [vmem:[#allocation7_spill] sm:$0xff] %v3784_v1  ;;  %v697_v20 = vshll.u32 %v3784_v1, 16  ;;  %v1843_v33 = vsel %vm810_vm0, %v1841_v53, %v1842_v55  ;;  %v1846_v53 = vsel %vm810_vm0, %v1844_v27, %v1845_v29  ;;  %v604_v55 = vor.u32 %v603_v42, %v599_v41  ;;  %v3865_v27 = vld [vmem:[%s3336_s30 + $0xac] sm:$0xf] }
  0x92   : > { %v3761_v5 = vpop.permute.xlu1 %987  ;;  %1775 = vrot.lane.b32.xlu1 %v1694_v2, %s3252_s21  ;;  %v695_v2 = vshrl.u32 %v3784_v1, 16  ;;  %v850_v10 = vrot.slane %v2764_v63, 1  ;;  %v2780_v41 = vcombine.low %v2617_v25, %v3865_v27  ;;  %v3880_v42 = vld [vmem:[%s3336_s30 + $0xa4] ss:$0 sps:$4 sm:$0x11]  }
  0x93   : > { %v3775_v50 = vpop.permute.xlu0 %971  ;;  %1759 = vrot.lane.b32.xlu0 %v1598_v40, %s3252_s21  ;;  %v699_v11 = vrot.slane %v697_v20, 1  ;;  %v597_v40 = vsel %vm537_vm1, %v592_v8, %v596_v17  ;;  %v609_v13 = vsel %vm537_vm1, %v604_v55, %v608_v56  ;;  %v824_v17 = vrot.slane %v3758_v35, 1  ;;  %v2599_v20 = vld [vmem:[%s3336_s30 + $0x3c] sm:$0xf] }
  0x94   : > { %v851_v35 = vrot.slane %v3799_v19, 1  ;;  %v1210_v55 = vshll.u32 %v2780_v41, 16  ;;  %v1203_v34 = vshll.u32 %v3880_v42, 16  ;;  %v3903_v63 = vld [vmem:[%s3336_s30 + $0x50] ss:$0 sps:$4 sm:$0x11]  }
  0x95   : > { %v700_v47 = vor.u32 %v699_v11, %v695_v2  ;;  %v826_v2 = vrot.slane %v2756_v26, 1  ;;  %v827_v11 = vrot.slane %v3806_v45, 1  ;;  %v2651_v26 = vld [vmem:[%s3336_s30 + $0x9c] sm:$0xe] }
  0x96   : > { %v3791_v6 = vpop.permute.xlu1 %875  ;;  %1777 = vrot.lane.b32.xlu1 %v1706_v52, %s3252_s21  ;;  %v852_v58 = vsel %vm810_vm0, %v850_v10, %v851_v35  ;;  %v1212_v10 = vrot.slane %v1210_v55, 1  ;;  %v2643_v25 = vld [vmem:[%s3336_s30 + $0x3c] sm:$0xe] }
  0x97   : > { %1761 = vrot.lane.b32.xlu0 %v1610_v62, %s3252_s21  ;;  %v847_v62 = vrot.slane %v2763_v9, 1  ;;  %v705_v7 = vsel %vm537_vm1, %v700_v47, %v704_v46  ;;  %v3885_v9 = vld [vmem:[%s3336_s30 + $0x44] ss:$0 sps:$4 sm:$0x11]  }
  0x98   : > { %v3802_v22 = vpop.permute.xlu0 %859 }
  0x99   : > { %v849_v61 = vsel %vm810_vm0, %v847_v62, %v848_v0  ;;  %v3897_v62 = vld [vmem:[%s3336_s30 + $0xb0] ss:$0 sps:$4 sm:$0x11]  }
  0x9a   : > { %1903 = vrot.lane.b32.xlu1 %v1867_v12, %s3253_s23  ;;  %v3844_v12 = vld [vmem:[%s3336_s30 + $0xa0] sm:$0xf]  ;;  %v1215_v35 = vshll.u32 %v3897_v62, 16 }
  0x9b   : > { %v3810_v24 = vpop.permute.xlu1 %877  ;;  %1887 = vrot.lane.b32.xlu0 %v1843_v33, %s3253_s23  ;;  %v3853_v33 = vld [vmem:[%s3336_s30 + $0x40] sm:$0xf]  ;;  %v2779_v14 = vcombine.low %v2615_v3, %v3844_v12 }
  0x9c   : > { %v2771_v48 = vcombine.low %v2599_v20, %v3853_v33  ;;  %v1205_v20 = vrot.slane %v1203_v34, 1  ;;  %v1217_v34 = vrot.slane %v1215_v35, 1 }
  0x9d   : > { %v3822_v59 = vpop.permute.xlu0 %861  ;;  %v1198_v19 = vshll.u32 %v2779_v14, 16 }
  0x9e   : > { %754 = vrot.lane.b32.xlu1 %v693_v30, %s3248_s6  ;;  %v825_v30 = vsel %vm810_vm0, %v823_v39, %v824_v17  ;;  %v1102_v43 = vshll.u32 %v2771_v48, 16  ;;  %v1100_v4 = vshrl.u32 %v2771_v48, 16  ;;  %v1208_v17 = vshrl.u32 %v2780_v41, 16 }
  0x9f   : > { %738 = vrot.lane.b32.xlu0 %v597_v40, %s3248_s6  ;;  %v3875_v40 = vld [vmem:[%s3336_s30 + $0x4c] sm:$0xf]  ;;  %v1200_v56 = vrot.slane %v1198_v19, 1 }
  0xa0   : > { %v3829_v52 = vpop.permute.xlu1 %732  ;;  %v2772_v47 = vcombine.low %v2601_v15, %v3875_v40  ;;  %v1104_v60 = vrot.slane %v1102_v43, 1  ;;  %v1119_v15 = vshll.u32 %v3903_v63, 16  ;;  %v3919_v43 = vld [vmem:[%s3336_s30 + $0xac] sm:$0xf] }
  0xa1   : > { %v3834_v36 = vpop.permute.xlu0 %730 }
  0xa2   : > { %1905 = vrot.lane.b32.xlu1 %v1870_v44, %s3253_s23  ;;  %v828_v44 = vsel %vm810_vm0, %v826_v2, %v827_v11  ;;  %v1114_v3 = vshll.u32 %v2772_v47, 16  ;;  %v1112_v11 = vshrl.u32 %v2772_v47, 16 }
  0xa3   : > { %1889 = vrot.lane.b32.xlu0 %v1846_v53, %s3253_s23  ;;  %v1196_v53 = vshrl.u32 %v2779_v14, 16 }
  0xa4   : > { %v3846_v16 = vpop.permute.xlu1 %748 }
  0xa5   : > { %v3855_v8 = vpop.permute.xlu0 %746  ;;  %v1201_v39 = vor.u32 %v1200_v56, %v1196_v53  ;;  %v2652_v53 = vld [vmem:[%s3336_s30 + $0xa8] sm:$0xe]  ;;  %v1213_v56 = vor.u32 %v1212_v10, %v1208_v17  ;;  %v3945_v10 = vld [vmem:[%s3336_s30 + $0xb8] sm:$0xf] }
  0xa6   : > { %756 = vrot.lane.b32.xlu1 %v705_v7, %s3248_s6  ;;  %v1107_v7 = vshll.u32 %v3885_v9, 16  ;;  %v2812_v17 = vcombine.low %v2652_v53, %v3865_v27  ;;  %v3953_v27 = vld [vmem:[%s3336_s30 + $0x58] sm:$0xf] }
  0xa7   : > { %740 = vrot.lane.b32.xlu0 %v609_v13, %s3248_s6  ;;  %v1206_v55 = vsel %vm537_vm1, %v1201_v39, %v1205_v20  ;;  %v3938_v39 = vld [vmem:[%s3336_s30 + $0x4c] sm:$0xf]  ;;  %v1360_v20 = vrot.slane %v3880_v42, 1 }
  0xa8   : > { %v3867_v29 = vpop.permute.xlu1 %989  ;;  %v1109_v2 = vrot.slane %v1107_v7, 1  ;;  %v1121_v7 = vrot.slane %v1119_v15, 1 }
  0xa9   : > { %v3871_v37 = vpop.permute.xlu0 %973 }
  0xaa   : > { %883 = vrot.lane.b32.xlu1 %v849_v61, %s3247_s5  ;;  %v1105_v61 = vor.u32 %v1104_v60, %v1100_v4  ;;  %v2644_v4 = vld [vmem:[%s3336_s30 + $0x48] sm:$0xe] }
  0xab   : > { %867 = vrot.lane.b32.xlu0 %v825_v30, %s3247_s5  ;;  %v2804_v35 = vcombine.low %v2644_v4, %v3875_v40  ;;  %v3963_v40 = vld [vmem:[%s3336_s30 + $0xb0] ss:$0 sps:$4 sm:$0x11]   ;;  %v1363_v4 = vrot.slane %v3897_v62, 1 }
  0xac   : > { %v3887_v45 = vpop.permute.xlu1 %1259 }
  0xad   : > { %v3891_v46 = vpop.permute.xlu0 %1243 }
  0xae   : > { %885 = vrot.lane.b32.xlu1 %v852_v58, %s3247_s5  ;;  %v2679_v58 = vld [vmem:[%s3336_s30 + $0xa8] sm:$0xf] }
  0xaf   : > { %869 = vrot.lane.b32.xlu0 %v828_v44, %s3247_s5  ;;  %v2803_v44 = vcombine.low %v2643_v25, %v3853_v33  ;;  %v1218_v25 = vsel %vm537_vm1, %v1213_v56, %v1217_v34 }
  0xb0   : > { %v3899_v0 = vpop.permute.xlu1 %1261 }
  0xb1   : > { %v3905_v13 = vpop.permute.xlu0 %1245 }
  0xb2   : > { %995 = vrot.lane.b32.xlu1 %v2779_v14, %s3246_s4  ;;  %v1116_v14 = vrot.slane %v1114_v3, 1  ;;  %v1110_v3 = vsel %vm537_vm1, %v1105_v61, %v1109_v2  ;;  %v2681_v61 = vld [vmem:[%s3336_s30 + $0xb4] sm:$0xf]  ;;  %v1335_v2 = vrot.slane %v2803_v44, 1 }
  0xb3   : > { %979 = vrot.lane.b32.xlu0 %v2771_v48, %s3246_s4  ;;  %v2811_v48 = vcombine.low %v2651_v26, %v3844_v12  ;;  %v3968_v44 = vcombine.low %v2681_v61, %v3945_v10 }
  0xb4   : > { %v3912_v30 = vpop.permute.xlu1 %1387  ;;  %v1117_v12 = vor.u32 %v1116_v14, %v1112_v11  ;;  %v1336_v11 = vrot.slane %v3885_v9, 1  ;;  %v2665_v14 = vld [vmem:[%s3336_s30 + $0x54] sm:$0xf] }
  0xb5   : > { %v3915_v19 = vpop.permute.xlu0 %1371  ;;  %v1359_v26 = vrot.slane %v2811_v48, 1  ;;  %v3973_v56 = vcombine.low %v2665_v14, %v3953_v27  ;;  %v1722_v62 = vshll.u32 %v3968_v44, 16 }
  0xb6   : > { %997 = vrot.lane.b32.xlu1 %v2780_v41, %s3246_s4  ;;  %v3932_v41 = vcombine.low %v2679_v58, %v3919_v43  ;;  %v1122_v58 = vsel %vm537_vm1, %v1117_v12, %v1121_v7  ;;  %v1337_v34 = vsel %vm810_vm0, %v1335_v2, %v1336_v11  ;;  %v1339_v12 = vrot.slane %v3903_v63, 1  ;;  %v3988_v63 = vld [vmem:[%s3336_s30 + $0x50] ss:$0 sps:$4 sm:$0x11]  }
  0xb7   : > { %981 = vrot.lane.b32.xlu0 %v2772_v47, %s3246_s4  ;;  %v2663_v47 = vld [vmem:[%s3336_s30 + $0x48] sm:$0xf]  ;;  %v1361_v9 = vsel %vm810_vm0, %v1359_v26, %v1360_v20  ;;  %v1715_v20 = vshll.u32 %v3963_v40, 16  ;;  %v3996_v2 = vld [vmem:[%s3336_s30 + $0xbc] ss:$0 sps:$4 sm:$0x11]   ;;  %v1917_v11 = vsel %vm1915_vm3, %v3373_v23, %v3834_v36 }
  0xb8   : > { %v3928_v60 = vpop.permute.xlu1 %1389  ;;  %v1710_v42 = vshll.u32 %v3932_v41, 16  ;;  %v3960_v48 = vcombine.low %v2663_v47, %v3938_v39 }
  0xb9   : > { %v3934_v33 = vpop.permute.xlu0 %1373  ;;  %v1717_v1 = vrot.slane %v1715_v20, 1 }
  0xba   : > { %1267 = vrot.lane.b32.xlu1 %v1206_v55, %s3249_s7  ;;  %v1362_v55 = vrot.slane %v2812_v17, 1  ;;  %v1614_v47 = vshll.u32 %v3960_v48, 16  ;;  %v1708_v17 = vshrl.u32 %v3932_v41, 16  ;;  %v1712_v26 = vrot.slane %v1710_v42, 1 }
  0xbb   : > { %1251 = vrot.lane.b32.xlu0 %v1110_v3, %s3249_s7  ;;  %v1338_v3 = vrot.slane %v2804_v35, 1  ;;  %v1933_v35 = vsel %vm1915_vm3, %v3368_v18, %v3855_v8  ;;  %v2715_v18 = vld [vmem:[%s3336_s30 + $0xa8] sm:$0xe]  ;;  %v4006_v8 = vld [vmem:[%s3336_s30 + $0x5c] ss:$0 sps:$4 sm:$0x11]  }
  0xbc   : > { %v3955_v15 = vpop.permute.xlu1 %1499  ;;  %v1364_v14 = vsel %vm810_vm0, %v1362_v55, %v1363_v4  ;;  %v1713_v49 = vor.u32 %v1712_v26, %v1708_v17  ;;  %v1612_v21 = vshrl.u32 %v3960_v48, 16  ;;  %v1616_v57 = vrot.slane %v1614_v47, 1 }
  0xbd   : > { %v3965_v53 = vpop.permute.xlu0 %1483  ;;  %v1966_v23 = vsel %vm1948_vm4, %v1933_v35, %v3791_v6  ;;  %v1720_v55 = vshrl.u32 %v3968_v44, 16  ;;  %v1724_v4 = vrot.slane %v1722_v62, 1  ;;  %v1624_v47 = vshrl.u32 %v3973_v56, 16 }
  0xbe   : > { %1269 = vrot.lane.b32.xlu1 %v1218_v25, %s3249_s7  ;;  %v1626_v25 = vshll.u32 %v3973_v56, 16  ;;  %v2859_v6 = vcombine.low %v2715_v18, %v3919_v43  ;;  %v1631_v20 = vshll.u32 %v4006_v8, 16  ;;  %v1718_v35 = vsel %vm537_vm1, %v1713_v49, %v1717_v1 }
  0xbf   : > { %1253 = vrot.lane.b32.xlu0 %v1122_v58, %s3249_s7  ;;  %v1340_v58 = vsel %vm810_vm0, %v1338_v3, %v1339_v12  ;;  %v1950_v3 = vsel %vm1948_vm4, %v1917_v11, %v3802_v22  ;;  %v1727_v12 = vshll.u32 %v3996_v2, 16  ;;  %v1999_v22 = vsel %vm1981_vm5, %v1966_v23, %v3761_v5  ;;  %v243_v11 = vld [vmem:[%s3336_s30 + $0xa8] sm:$0xf]  ;;  %v4040_v23 = vld [vmem:[%s3336_s30 + $0x4c] sm:$0xf] }
  0xc0   : > { %v3979_v7 = vpop.permute.xlu1 %1501  ;;  %v1628_v17 = vrot.slane %v1626_v25, 1  ;;  %v1617_v25 = vor.u32 %v1616_v57, %v1612_v21  ;;  %v2032_v43 = vsel %vm2014_vm6, %v1999_v22, %v3887_v45  ;;  %v227_v5 = vld [vmem:[%s3336_s30 + $0x48] sm:$0xf]  ;;  %v245_v22 = vld [vmem:[%s3336_s30 + $0xb4] sm:$0xf] }
  0xc1   : > { %v3984_v61 = vpop.permute.xlu0 %1485  ;;  %v2065_v57 = vsel %vm2047_vm7, %v2032_v43, %v3912_v30  ;;  %v1729_v21 = vrot.slane %v1727_v12, 1  ;;  %v1935_v30 = vsel %vm1915_vm3, %v3380_v31, %v3846_v16  ;;  %v1871_v31 = vrot.slane %v2859_v6, 1  ;;  %v4072_v16 = vld [vmem:[%s3336_s30 + $0xb0] ss:$0 sps:$4 sm:$0x11]  }
  0xc2   : > { %1395 = vrot.lane.b32.xlu1 %v1361_v9, %s3250_s8  ;;  %v2707_v9 = vld [vmem:[%s3336_s30 + $0x48] sm:$0xe]  ;;  %v1629_v49 = vor.u32 %v1628_v17, %v1624_v47  ;;  %v2098_v45 = vsel %vm2080_vm8, %v2065_v57, %v3955_v15  ;;  %v4064_v15 = vcombine.low %v227_v5, %v4040_v23  ;;  %v1968_v47 = vsel %vm1948_vm4, %v1935_v30, %v3810_v24 }
  0xc3   : > { %1379 = vrot.lane.b32.xlu0 %v1337_v34, %s3250_s8  ;;  %v1619_v34 = vshll.u32 %v3988_v63, 16  ;;  %v2851_v26 = vcombine.low %v2707_v9, %v3938_v39  ;;  %v1983_v39 = vsel %vm1981_vm5, %v1950_v3, %v3775_v50  ;;  %v1725_v9 = vor.u32 %v1724_v4, %v1720_v55 }
  0xc4   : > { %v1772_v42 = vpop.permute.xlu1 %1771  ;;  %v2016_v1 = vsel %vm2014_vm6, %v1983_v39, %v3891_v46  ;;  %v1848_v17 = vrot.slane %v3988_v63, 1  ;;  %v714_v43 = vshll.u32 %v4072_v16, 16  ;;  %v229_v39 = vld [vmem:[%s3336_s30 + $0x54] sm:$0xf] }
  0xc5   : > { %v1756_v36 = vpop.permute.xlu0 %1755  ;;  %v1621_v18 = vrot.slane %v1619_v34, 1  ;;  %v2049_v50 = vsel %vm2047_vm7, %v2016_v1, %v3915_v19  ;;  %v1633_v34 = vrot.slane %v1631_v20, 1  ;;  %v2131_v19 = vsel %vm2113_vm9, %v2098_v45, %v1772_v42 }
  0xc6   : > { %1397 = vrot.lane.b32.xlu1 %v1364_v14, %s3250_s8  ;;  %v4030_v14 = vld [vmem:[%s3336_s30 + $0xac] sm:$0xf]  ;;  %v613_v20 = vshll.u32 %v4064_v15, 16 }
  0xc7   : > { %1381 = vrot.lane.b32.xlu0 %v1340_v58, %s3250_s8  ;;  %v4055_v46 = vcombine.low %v243_v11, %v4030_v14  ;;  %v1622_v42 = vsel %vm537_vm1, %v1617_v25, %v1621_v18  ;;  %v4101_v25 = vld [vmem:[%s3336_s30 + $0xb8] sm:$0xf] }
  0xc8   : > { %v4025_v62 = vpop.permute.xlu1 %1773  ;;  %v4113_v18 = vld [vmem:[%s3336_s30 + $0x58] sm:$0xf] }
  0xc9   : > { %v4036_v58 = vpop.permute.xlu0 %1757  ;;  %v709_v6 = vshll.u32 %v4055_v46, 16 }
  0xca   : > { %1507 = vrot.lane.b32.xlu1 %v3932_v41, %s3251_s11  ;;  %v2082_v41 = vsel %vm2080_vm8, %v2049_v50, %v3965_v53  ;;  %v4130_v50 = vcombine.low %v245_v22, %v4101_v25 }
  0xcb   : > { %1491 = vrot.lane.b32.xlu0 %v3960_v48, %s3251_s11  ;;  %v1919_v48 = vsel %vm1915_vm3, %v3386_v38, %v3829_v52  ;;  %v2115_v4 = vsel %vm2113_vm9, %v2082_v41, %v1756_v36  ;;  %v1872_v38 = vrot.slane %v3963_v40, 1  ;;  %v1847_v52 = vrot.slane %v2851_v26, 1  ;;  %v4081_v36 = vld [vmem:[%s3336_s30 + $0x50] ss:$0 sps:$4 sm:$0x11]  }
  0xcc   : > { %v1900_v55 = vpop.permute.xlu1 %1899  ;;  %v2001_v40 = vsel %vm1981_vm5, %v1968_v47, %v3867_v29  ;;  %v1952_v26 = vsel %vm1948_vm4, %v1919_v48, %v3822_v59  ;;  %v707_v59 = vshrl.u32 %v4055_v46, 16  ;;  %v716_v48 = vrot.slane %v714_v43, 1  ;;  %v269_v43 = vld [vmem:[%s3336_s30 + $0x48] sm:$0xe] }
  0xcd   : > { %v1884_v3 = vpop.permute.xlu0 %1883  ;;  %v2164_v12 = vsel %vm2146_vm10, %v2131_v19, %v1900_v55  ;;  %v1985_v63 = vsel %vm1981_vm5, %v1952_v26, %v3871_v37  ;;  %v2034_v29 = vsel %vm2014_vm6, %v2001_v40, %v3899_v0  ;;  %v611_v37 = vshrl.u32 %v4064_v15, 16 }
  0xce   : > { %1509 = vrot.lane.b32.xlu1 %v3968_v44, %s3251_s11  ;;  %v2148_v53 = vsel %vm2146_vm10, %v2115_v4, %v1884_v3  ;;  %2930 = vmatprep.mubr.msk.bf16.mxu1 %vm2206_vm11, %v2164_v12  ;;  %v1730_v44 = vsel %vm537_vm1, %v1725_v9, %v1729_v21  ;;  %v2018_v9 = vsel %vm2014_vm6, %v1985_v63, %v3905_v13  ;;  %v618_v0 = vshll.u32 %v4081_v36, 16  ;;  %v2716_v21 = vld [vmem:[%s3336_s30 + $0xb4] sm:$0xe]  ;;  %v4151_v4 = vld [vmem:[%s3336_s30 + $0xbc] ss:$0 sps:$4 sm:$0x11]  }
  0xcf   : > { %1493 = vrot.lane.b32.xlu0 %v3973_v56, %s3251_s11  ;;  %2914 = vmatprep.mubr.msk.bf16.mxu0 %vm2206_vm11, %v2148_v53  ;;  %v1634_v56 = vsel %vm537_vm1, %v1629_v49, %v1633_v34  ;;  %v2067_v5 = vsel %vm2047_vm7, %v2034_v29, %v3928_v60  ;;  %v2051_v1 = vsel %vm2047_vm7, %v2018_v9, %v3934_v33  ;;  %v2708_v49 = vld [vmem:[%s3336_s30 + $0x54] sm:$0xe]  ;;  %v711_v13 = vrot.slane %v709_v6, 1 }
  0xd0   : > { %v4095_v24 = vpop.permute.xlu1 %750  ;;  %v2100_v57 = vsel %vm2080_vm8, %v2067_v5, %v3979_v7  ;;  %v2084_v60 = vsel %vm2080_vm8, %v2051_v1, %v3984_v61  ;;  %v615_v33 = vrot.slane %v613_v20, 1  ;;  %v4137_v34 = vcombine.low %v229_v39, %v4113_v18 }
  0xd1   : > { %v4107_v11 = vpop.permute.xlu0 %734  ;;  %v2117_v7 = vsel %vm2113_vm9, %v2084_v60, %v4036_v58  ;;  %v2860_v19 = vcombine.low %v2716_v21, %v3945_v10  ;;  %v2852_v61 = vcombine.low %v2708_v49, %v3953_v27  ;;  %v712_v58 = vor.u32 %v711_v13, %v707_v59  ;;  %v278_v13 = vld [vmem:[%s3336_s30 + $0xb4] sm:$0xe] }
  0xd2   : > { %1779 = vrot.lane.b32.xlu1 %v1718_v35, %s3252_s21  ;;  %v2133_v35 = vsel %vm2113_vm9, %v2100_v57, %v4025_v62  ;;  %v1873_v62 = vsel %vm810_vm0, %v1871_v31, %v1872_v38  ;;  %v721_v10 = vshll.u32 %v4130_v50, 16  ;;  %v1849_v27 = vsel %vm810_vm0, %v1847_v52, %v1848_v17 }
  0xd3   : > { %1763 = vrot.lane.b32.xlu0 %v1622_v42, %s3252_s21  ;;  %v616_v12 = vor.u32 %v615_v33, %v611_v37  ;;  %v620_v53 = vrot.slane %v618_v0, 1  ;;  %v4158_v42 = vld [vmem:[%s3336_s30 + $0x5c] ss:$0 sps:$4 sm:$0x11]   ;;  %v625_v47 = vshll.u32 %v4137_v34, 16  ;;  %v1874_v31 = vrot.slane %v2860_v19, 1 }
  0xd4   : > { %v1902_v45 = vpop.permute.xlu1 %1901  ;;  %v1875_v38 = vrot.slane %v3996_v2, 1  ;;  %v1850_v6 = vrot.slane %v2852_v61, 1  ;;  %v1851_v40 = vrot.slane %v4006_v8, 1  ;;  %v717_v52 = vsel %vm537_vm1, %v712_v58, %v716_v48  ;;  %v277_v8 = vld [vmem:[%s3336_s30 + $0xa8] sm:$0xe] }
  0xd5   : > { %v2166_v30 = vsel %vm2146_vm10, %v2133_v35, %v1902_v45  ;;  %v1886_v41 = vpop.permute.xlu0 %1885  ;;  %v719_v17 = vshrl.u32 %v4130_v50, 16  ;;  %v723_v26 = vrot.slane %v721_v10, 1  ;;  %v621_v22 = vsel %vm537_vm1, %v616_v12, %v620_v53  ;;  %v270_v35 = vld [vmem:[%s3336_s30 + $0x54] sm:$0xe] }
  0xd6   : > { %v2150_v55 = vsel %vm2146_vm10, %v2117_v7, %v1886_v41  ;;  %1781 = vrot.lane.b32.xlu1 %v1730_v44, %s3252_s21  ;;  %2931 = vmatmul.mubr.msk.bf16.vlgmr.msra.gmra.mrb[0].mxu1 %vm2206_vm11, %v2166_v30  ;;  %v623_v63 = vshrl.u32 %v4137_v34, 16  ;;  %v627_v29 = vrot.slane %v625_v47, 1  ;;  %v630_v2 = vshll.u32 %v4158_v42, 16  ;;  %v2603_v48 = vld [vmem:[%s3336_s30 + $0x54] sm:$0xf] }
  0xd7   : > { %1765 = vrot.lane.b32.xlu0 %v1634_v56, %s3252_s21  ;;  %2915 = vmatmul.mubr.msk.bf16.vlgmr.msra.gmra.mrb[0].mxu0 %vm2206_vm11, %v2150_v55  ;;  %v726_v56 = vshll.u32 %v4151_v4, 16  ;;  %v1876_v39 = vsel %vm810_vm0, %v1874_v31, %v1875_v38  ;;  %v724_v9 = vor.u32 %v723_v26, %v719_v17  ;;  %v2765_v37 = vcombine.low %v277_v8, %v4030_v14  ;;  %v2619_v55 = vld [vmem:[%s3336_s30 + $0xb4] sm:$0xf]  ;;  %v2621_v38 = vld [vmem:[%s3336_s30 + $0xc0] sm:$0xf] }
  0xd8   : > { %v4154_v3 = vpop.permute.xlu1 %752  ;;  %v1852_v1 = vsel %vm810_vm0, %v1850_v6, %v1851_v40  ;;  %v628_v57 = vor.u32 %v627_v29, %v623_v63  ;;  %v632_v21 = vrot.slane %v630_v2, 1  ;;  %v2757_v49 = vcombine.low %v269_v43, %v4040_v23  ;;  %v4223_v6 = vld [vmem:[%s3336_s30 + $0xc4] sm:$0xf] }
  0xd9   : > { %v4161_v44 = vpop.permute.xlu0 %736  ;;  %v728_v5 = vrot.slane %v726_v56, 1  ;;  %v853_v45 = vrot.slane %v2765_v37, 1  ;;  %v854_v33 = vrot.slane %v4072_v16, 1  ;;  %v2766_v7 = vcombine.low %v278_v13, %v4101_v25  ;;  %v4209_v16 = vld [vmem:[%s3336_s30 + $0x58] sm:$0xf] }
  0xda   : > { %1907 = vrot.lane.b32.xlu1 %v1873_v62, %s3253_s23  ;;  %v633_v23 = vsel %vm537_vm1, %v628_v57, %v632_v21  ;;  %v829_v41 = vrot.slane %v2757_v49, 1  ;;  %v830_v19 = vrot.slane %v4081_v36, 1  ;;  %v2758_v61 = vcombine.low %v270_v35, %v4113_v18  ;;  %v4203_v62 = vld [vmem:[%s3336_s30 + $0xb8] sm:$0xf]  ;;  %v4229_v17 = vld [vmem:[%s3336_s30 + $0x64] sm:$0xf] }
  0xdb   : > { %1891 = vrot.lane.b32.xlu0 %v1849_v27, %s3253_s23  ;;  %v729_v14 = vsel %vm537_vm1, %v724_v9, %v728_v5  ;;  %v855_v36 = vsel %vm810_vm0, %v853_v45, %v854_v33  ;;  %v856_v25 = vrot.slane %v2766_v7, 1  ;;  %v857_v18 = vrot.slane %v4151_v4, 1  ;;  %v4233_v4 = vld [vmem:[%s3336_s30 + $0xbc] ss:$0 sps:$4 sm:$0x11]  }
  0xdc   : > { %v4170_v20 = vpop.permute.xlu1 %879  ;;  %v2781_v10 = vcombine.low %v2619_v55, %v4203_v62  ;;  %v831_v12 = vsel %vm810_vm0, %v829_v41, %v830_v19  ;;  %v832_v53 = vrot.slane %v2758_v61, 1  ;;  %v833_v47 = vrot.slane %v4158_v42, 1  ;;  %v4257_v35 = vld [vmem:[%s3336_s30 + $0x68] ss:$0 sps:$4 sm:$0x11]  }
  0xdd   : > { %v4176_v59 = vpop.permute.xlu0 %863  ;;  %v2773_v31 = vcombine.low %v2603_v48, %v4209_v16  ;;  %v858_v26 = vsel %vm810_vm0, %v856_v25, %v857_v18  ;;  %v2782_v42 = vcombine.low %v2621_v38, %v4223_v6  ;;  %v1227_v9 = vshll.u32 %v4233_v4, 16 }
  0xde   : > { %758 = vrot.lane.b32.xlu1 %v717_v52, %s3248_s6  ;;  %v2605_v52 = vld [vmem:[%s3336_s30 + $0x60] sm:$0xf]  ;;  %v1222_v56 = vshll.u32 %v2781_v10, 16  ;;  %v834_v29 = vsel %vm810_vm0, %v832_v53, %v833_v47  ;;  %v1143_v18 = vshll.u32 %v4257_v35, 16  ;;  %v2645_v53 = vld [vmem:[%s3336_s30 + $0x54] sm:$0xe] }
  0xdf   : > { %742 = vrot.lane.b32.xlu0 %v621_v22, %s3248_s6  ;;  %v4239_v22 = vld [vmem:[%s3336_s30 + $0x5c] ss:$0 sps:$4 sm:$0x11]   ;;  %v2774_v2 = vcombine.low %v2605_v52, %v4229_v17  ;;  %v1126_v8 = vshll.u32 %v2773_v31, 16  ;;  %v1234_v57 = vshll.u32 %v2782_v42, 16  ;;  %v1124_v49 = vshrl.u32 %v2773_v31, 16 }
  0xe0   : > { %v4183_v0 = vpop.permute.xlu1 %881  ;;  %v1224_v5 = vrot.slane %v1222_v56, 1  ;;  %v1131_v37 = vshll.u32 %v4239_v22, 16  ;;  %v1229_v33 = vrot.slane %v1227_v9, 1  ;;  %v1232_v7 = vshrl.u32 %v2782_v42, 16  ;;  %v2654_v9 = vld [vmem:[%s3336_s30 + $0xc0] sm:$0xe] }
  0xe1   : > { %v4188_v60 = vpop.permute.xlu0 %865  ;;  %v1128_v13 = vrot.slane %v1126_v8, 1  ;;  %v1236_v19 = vrot.slane %v1234_v57, 1  ;;  %v1145_v8 = vrot.slane %v1143_v18, 1 }
  0xe2   : > { %1909 = vrot.lane.b32.xlu1 %v1876_v39, %s3253_s23  ;;  %v1220_v39 = vshrl.u32 %v2781_v10, 16  ;;  %v1133_v41 = vrot.slane %v1131_v37, 1  ;;  %v4285_v37 = vld [vmem:[%s3336_s30 + $0xc4] sm:$0xf] }
  0xe3   : > { %1893 = vrot.lane.b32.xlu0 %v1852_v1, %s3253_s23  ;;  %v4252_v1 = vld [vmem:[%s3336_s30 + $0xc8] ss:$0 sps:$4 sm:$0x11]   ;;  %v1129_v48 = vor.u32 %v1128_v13, %v1124_v49  ;;  %v2814_v13 = vcombine.low %v2654_v9, %v4223_v6 }
  0xe4   : > { %v4196_v30 = vpop.permute.xlu1 %991  ;;  %v1239_v61 = vshll.u32 %v4252_v1, 16  ;;  %v1369_v18 = vrot.slane %v4252_v1, 1 }
  0xe5   : > { %v4205_v58 = vpop.permute.xlu0 %975  ;;  %v1134_v56 = vsel %vm537_vm1, %v1129_v48, %v1133_v41  ;;  %v2685_v48 = vld [vmem:[%s3336_s30 + $0xcc] sm:$0xf] }
  0xe6   : > { %760 = vrot.lane.b32.xlu1 %v729_v14, %s3248_s6  ;;  %v1138_v14 = vshll.u32 %v2774_v2, 16  ;;  %v1241_v38 = vrot.slane %v1239_v61, 1 }
  0xe7   : > { %744 = vrot.lane.b32.xlu0 %v633_v23, %s3248_s6  ;;  %v1225_v23 = vor.u32 %v1224_v5, %v1220_v39  ;;  %v2805_v39 = vcombine.low %v2645_v53, %v4209_v16  ;;  %v2683_v5 = vld [vmem:[%s3336_s30 + $0xc0] sm:$0xf]  ;;  %v1342_v16 = vrot.slane %v4239_v22, 1  ;;  %v4308_v22 = vld [vmem:[%s3336_s30 + $0xd0] sm:$0xf] }
  0xe8   : > { %v4216_v27 = vpop.permute.xlu1 %993  ;;  %v1140_v25 = vrot.slane %v1138_v14, 1  ;;  %v2667_v14 = vld [vmem:[%s3336_s30 + $0x60] sm:$0xf] }
  0xe9   : > { %v4225_v40 = vpop.permute.xlu0 %977  ;;  %v1230_v47 = vsel %vm537_vm1, %v1225_v23, %v1229_v33  ;;  %v4295_v33 = vld [vmem:[%s3336_s30 + $0x64] sm:$0xf]  ;;  %v1341_v41 = vrot.slane %v2805_v39, 1  ;;  %v4330_v39 = vld [vmem:[%s3336_s30 + $0x68] ss:$0 sps:$4 sm:$0x11]  }
  0xea   : > { %887 = vrot.lane.b32.xlu1 %v855_v36, %s3247_s5  ;;  %v1136_v36 = vshrl.u32 %v2774_v2, 16  ;;  %v2821_v6 = vcombine.low %v2667_v14, %v4295_v33  ;;  %v1643_v14 = vshll.u32 %v4330_v39, 16 }
  0xeb   : > { %871 = vrot.lane.b32.xlu0 %v831_v12, %s3247_s5  ;;  %v2653_v12 = vld [vmem:[%s3336_s30 + $0xb4] sm:$0xe]  ;;  %v1343_v53 = vsel %vm810_vm0, %v1341_v41, %v1342_v16  ;;  %v1937_v41 = vsel %vm1915_vm3, %v3524_v51, %v4095_v24 }
  0xec   : > { %v4241_v63 = vpop.permute.xlu1 %1263  ;;  %v2813_v52 = vcombine.low %v2653_v12, %v4203_v62  ;;  %v1366_v62 = vrot.slane %v4233_v4, 1  ;;  %v1638_v9 = vshll.u32 %v2821_v6, 16 }
  0xed   : > { %v4245_v43 = vpop.permute.xlu0 %1247 }
  0xee   : > { %889 = vrot.lane.b32.xlu1 %v858_v26, %s3247_s5  ;;  %v1365_v49 = vrot.slane %v2813_v52, 1 }
  0xef   : > { %873 = vrot.lane.b32.xlu0 %v834_v29, %s3247_s5  ;;  %v1141_v29 = vor.u32 %v1140_v25, %v1136_v36  ;;  %v4311_v36 = vld [vmem:[%s3336_s30 + $0xc8] ss:$0 sps:$4 sm:$0x11]   ;;  %v1368_v25 = vrot.slane %v2814_v13, 1 }
  0xf0   : > { %v4254_v21 = vpop.permute.xlu1 %1265  ;;  %v1739_v1 = vshll.u32 %v4311_v36, 16 }
  0xf1   : > { %v4259_v45 = vpop.permute.xlu0 %1249  ;;  %v1146_v23 = vsel %vm537_vm1, %v1141_v29, %v1145_v8  ;;  %v4324_v29 = vcombine.low %v2685_v48, %v4308_v22  ;;  %v4327_v8 = vld [vmem:[%s3336_s30 + $0x70] sm:$0xf]  ;;  %v1636_v48 = vshrl.u32 %v2821_v6, 16 }
  0xf2   : > { %999 = vrot.lane.b32.xlu1 %v2781_v10, %s3246_s4 }
  0xf3   : > { %983 = vrot.lane.b32.xlu0 %v2773_v31, %s3246_s4  ;;  %v1237_v31 = vor.u32 %v1236_v19, %v1232_v7  ;;  %v2829_v19 = vcombine.low %v2683_v5, %v4285_v37 }
  0xf4   : > { %v4264_v55 = vpop.permute.xlu1 %1391 }
  0xf5   : > { %v4268_v10 = vpop.permute.xlu0 %1375  ;;  %v1242_v57 = vsel %vm537_vm1, %v1237_v31, %v1241_v38  ;;  %v1345_v31 = vrot.slane %v4257_v35, 1  ;;  %v2669_v38 = vld [vmem:[%s3336_s30 + $0x6c] sm:$0xf]  ;;  %v1734_v52 = vshll.u32 %v2829_v19, 16  ;;  %v1370_v35 = vsel %vm810_vm0, %v1368_v25, %v1369_v18 }
  0xf6   : > { %1001 = vrot.lane.b32.xlu1 %v2782_v42, %s3246_s4  ;;  %v1921_v25 = vsel %vm1915_vm3, %v3527_v54, %v4107_v11  ;;  %v1970_v18 = vsel %vm1948_vm4, %v1937_v41, %v4170_v20 }
  0xf7   : > { %985 = vrot.lane.b32.xlu0 %v2774_v2, %s3246_s4  ;;  %v2646_v2 = vld [vmem:[%s3336_s30 + $0x60] sm:$0xe]  ;;  %v1736_v16 = vrot.slane %v1734_v52, 1  ;;  %v1954_v51 = vsel %vm1948_vm4, %v1921_v25, %v4176_v59  ;;  %v2003_v24 = vsel %vm1981_vm5, %v1970_v18, %v4196_v30  ;;  %s2589_s4 = sshll.u32 %s199_s28, 8 }
  0xf8   : > { %v4275_v26 = vpop.permute.xlu1 %1393  ;;  %v2806_v4 = vcombine.low %v2646_v2, %v4229_v17  ;;  %v1367_v17 = vsel %vm810_vm0, %v1365_v49, %v1366_v62  ;;  %v4337_v2 = vld [vmem:[%s3336_s30 + $0xd4] ss:$0 sps:$4 sm:$0x11]   ;;  %v1732_v49 = vshrl.u32 %v2829_v19, 16  ;;  %v1987_v20 = vsel %vm1981_vm5, %v1954_v51, %v4205_v58  ;;  %v2717_v58 = vld [vmem:[%s3336_s30 + $0xc0] sm:$0xe] }
  0xf9   : > { %v4280_v42 = vpop.permute.xlu0 %1377  ;;  %v2036_v52 = vsel %vm2014_vm6, %v2003_v24, %v4241_v63  ;;  %v2020_v59 = vsel %vm2014_vm6, %v1987_v20, %v4245_v43  ;;  %v2710_v24 = vld [vmem:[%s3336_s30 + $0x6c] sm:$0xe]  ;;  %s4560_s6 = scalar_lea.vmem [#allocation2], %s2589_s4 }
  0xfa   : > { %1271 = vrot.lane.b32.xlu1 %v1230_v47, %s3249_s7  ;;  %v1344_v47 = vrot.slane %v2806_v4, 1  ;;  %v1741_v4 = vrot.slane %v1739_v1, 1  ;;  %v1737_v54 = vor.u32 %v1736_v16, %v1732_v49  ;;  %v2069_v30 = vsel %vm2047_vm7, %v2036_v52, %v4264_v55 }
  0xfb   : > { %1255 = vrot.lane.b32.xlu0 %v1134_v56, %s3249_s7  ;;  %v2053_v63 = vsel %vm2047_vm7, %v2020_v59, %v4268_v10 }
  0xfc   : > { %v4297_v7 = vpop.permute.xlu1 %1503  ;;  %v1346_v62 = vsel %vm810_vm0, %v1344_v47, %v1345_v31  ;;  %v1751_v47 = vshll.u32 %v4337_v2, 16  ;;  %v4358_v31 = vld [vmem:[%s3336_s30 + $0x74] ss:$0 sps:$4 sm:$0x11]   ;;  %v1742_v41 = vsel %vm537_vm1, %v1737_v54, %v1741_v4  ;;  %v1923_v4 = vsel %vm1915_vm3, %v3570_v32, %v4161_v44 }
  0xfd   : > { %v4302_v61 = vpop.permute.xlu0 %1487  ;;  %v2102_v16 = vsel %vm2080_vm8, %v2069_v30, %v4297_v7  ;;  %v1655_v43 = vshll.u32 %v4358_v31, 16 }
  0xfe   : > { %1273 = vrot.lane.b32.xlu1 %v1242_v57, %s3249_s7  ;;  %v4341_v57 = vcombine.low %v2669_v38, %v4327_v8  ;;  %v2086_v55 = vsel %vm2080_vm8, %v2053_v63, %v4302_v61  ;;  %v1939_v61 = vsel %vm1915_vm3, %v3565_v28, %v4154_v3  ;;  %v1956_v3 = vsel %vm1948_vm4, %v1923_v4, %v4188_v60 }
  0xff   : > { %1257 = vrot.lane.b32.xlu0 %v1146_v23, %s3249_s7  ;;  %v1746_v23 = vshll.u32 %v4324_v29, 16  ;;  %v1657_v44 = vrot.slane %v1655_v43, 1  ;;  %v1878_v60 = vrot.slane %v4311_v36, 1  ;;  %s2888_s7 = sshll.u32 %s3236_s15, 12 }
 0x100   : > { %v4316_v12 = vpop.permute.xlu1 %1505  ;;  %v1650_v11 = vshll.u32 %v4341_v57, 16  ;;  %v1648_v49 = vshrl.u32 %v4341_v57, 16  ;;  %s4619_s10 = scalar_lea.hbm %s4680_s3, %s2888_s7 }
 0x101   : > { %v4321_v56 = vpop.permute.xlu0 %1489 }
 0x102   : > { %1399 = vrot.lane.b32.xlu1 %v1367_v17, %s3250_s8  ;;  %v1640_v17 = vrot.slane %v1638_v9, 1  ;;  %v1645_v9 = vrot.slane %v1643_v14, 1  ;;  %v1753_v14 = vrot.slane %v1751_v47, 1  ;;  %v2718_v47 = vld [vmem:[%s3336_s30 + $0xcc] sm:$0xe] }
 0x103   : > { %1383 = vrot.lane.b32.xlu0 %v1343_v53, %s3250_s8  ;;  %v1744_v53 = vshrl.u32 %v4324_v29, 16  ;;  %v2862_v52 = vcombine.low %v2718_v47, %v4308_v22 }
 0x104   : > { %v1776_v5 = vpop.permute.xlu1 %1775 }
 0x105   : > { %v1760_v13 = vpop.permute.xlu0 %1759 }
 0x106   : > { %1401 = vrot.lane.b32.xlu1 %v1370_v35, %s3250_s8  ;;  %v1748_v35 = vrot.slane %v1746_v23, 1  ;;  %v2119_v10 = vsel %vm2113_vm9, %v2086_v55, %v1760_v13 }
 0x107   : > { %1385 = vrot.lane.b32.xlu0 %v1346_v62, %s3250_s8  ;;  %v1641_v62 = vor.u32 %v1640_v17, %v1636_v48  ;;  %v1652_v48 = vrot.slane %v1650_v11, 1  ;;  %v2709_v17 = vld [vmem:[%s3336_s30 + $0x60] sm:$0xe]  ;;  %s2483_s8 = sshll.u32 %s4560_s6, 4  ;;  %s4623_s8 = int_to_ptr.vmem [resolvable:$true] %s2483_s8 }
 0x108   : > { %v4364_v38 = vpop.permute.xlu1 %1777  ;;  %v1749_v18 = vor.u32 %v1748_v35, %v1744_v53  ;;  %v2853_v28 = vcombine.low %v2709_v17, %v4295_v33  ;;  %v2854_v35 = vcombine.low %v2710_v24, %v4327_v8  ;;  %v1881_v8 = vrot.slane %v4337_v2, 1  ;;  %s3166_s18 = scalar_lea.vmem %s4623_s8, 4096 }
 0x109   : > { %v4371_v1 = vpop.permute.xlu0 %1761  ;;  %v1646_v13 = vsel %vm537_vm1, %v1641_v62, %v1645_v9  ;;  %v1653_v32 = vor.u32 %v1652_v48, %v1648_v49  ;;  %v1857_v49 = vrot.slane %v4358_v31, 1  ;;  %p3167_p12 = scmp.ne.s32.totalorder %s4623_s8, %s3166_s18 }
 0x10a   : > { %1511 = vrot.lane.b32.xlu1 %v2829_v19, %s3251_s11  ;;  %v2135_v19 = vsel %vm2113_vm9, %v2102_v16, %v1776_v5  ;;  %v1754_v33 = vsel %vm537_vm1, %v1749_v18, %v1753_v14  ;;  %v1853_v36 = vrot.slane %v2853_v28, 1  ;;  %v1856_v62 = vrot.slane %v2854_v35, 1 }
 0x10b   : > { %1495 = vrot.lane.b32.xlu0 %v2821_v6, %s3251_s11  ;;  %v2861_v6 = vcombine.low %v2717_v58, %v4285_v37  ;;  %v1972_v37 = vsel %vm1948_vm4, %v1939_v61, %v4183_v0  ;;  %v1989_v0 = vsel %vm1981_vm5, %v1956_v3, %v4225_v40  ;;  %v1854_v40 = vrot.slane %v4330_v39, 1  ;;  %p3168_p13 = pnand %p3167_p12, %p3316_p4 }
 0x10c   : > { %v1904_v23 = vpop.permute.xlu1 %1903  ;;  %v1658_v39 = vsel %vm537_vm1, %v1653_v32, %v1657_v44  ;;  %v1858_v14 = vsel %vm810_vm0, %v1856_v62, %v1857_v49  ;;  %v4692_v44 = vld [vmem:[#allocation6_spill] sm:$0xff] }
 0x10d   : > { %v2168_v25 = vsel %vm2146_vm10, %v2135_v19, %v1904_v23  ;;  %v1888_v7 = vpop.permute.xlu0 %1887  ;;  %v1877_v11 = vrot.slane %v2861_v6, 1  ;;  %p3169_p0 = pneg %p3168_p13 }
 0x10e   : > { %v2152_v5 = vsel %vm2146_vm10, %v2119_v10, %v1888_v7  ;;  %1513 = vrot.lane.b32.xlu1 %v4324_v29, %s3251_s11  ;;  %2934 = vmatprep.mubr.msk.bf16.mxu1 %vm2206_vm11, %v2168_v25  ;;  %v2005_v29 = vsel %vm1981_vm5, %v1972_v37, %v4216_v27  ;;  %v2022_v27 = vsel %vm2014_vm6, %v1989_v0, %v4259_v45 }
 0x10f   : > { %1497 = vrot.lane.b32.xlu0 %v4341_v57, %s3251_s11  ;;  %2918 = vmatprep.mubr.msk.bf16.mxu0 %vm2206_vm11, %v2152_v5  ;;  %v2038_v57 = vsel %vm2014_vm6, %v2005_v29, %v4254_v21  ;;  %v2055_v21 = vsel %vm2047_vm7, %v2022_v27, %v4280_v42  ;;  %v1879_v22 = vsel %vm810_vm0, %v1877_v11, %v1878_v60  ;;  %v4691_v29 = vld [vmem:[#allocation5_spill] sm:$0xff]  ;;  %s4630_s11 = scalar_lea.sflag [#allocation3], %s199_s28 }
 0x110   : > { %v4415_v53 = vpop.permute.xlu1 %754  ;;  %v2071_v54 = vsel %vm2047_vm7, %v2038_v57, %v4275_v26  ;;  %v2088_v45 = vsel %vm2080_vm8, %v2055_v21, %v4321_v56  ;;  %v1880_v56 = vrot.slane %v2862_v52, 1 }
 0x111   : > { %v4422_v51 = vpop.permute.xlu0 %738  ;;  %v2104_v20 = vsel %vm2080_vm8, %v2071_v54, %v4316_v12  ;;  %v2121_v42 = vsel %vm2113_vm9, %v2088_v45, %v4371_v1  ;;  %v1855_v1 = vsel %vm810_vm0, %v1853_v36, %v1854_v40  ;;  %v1941_v32 = vsel %vm1915_vm3, %v4691_v29, %v4415_v53 }
 0x112   : > { %1783 = vrot.lane.b32.xlu1 %v1742_v41, %s3252_s21  ;;  %v2137_v26 = vsel %vm2113_vm9, %v2104_v20, %v4364_v38  ;;  %v1882_v63 = vsel %vm810_vm0, %v1880_v56, %v1881_v8  ;;  %v1925_v47 = vsel %vm1915_vm3, %v4692_v44, %v4422_v51 }
 0x113   : > { %1767 = vrot.lane.b32.xlu0 %v1646_v13, %s3252_s21 }
 0x114   : > { %v1906_v9 = vpop.permute.xlu1 %1905 }
 0x115   : > { %v2170_v12 = vsel %vm2146_vm10, %v2137_v26, %v1906_v9  ;;  %v1890_v59 = vpop.permute.xlu0 %1889  ;;  %v4693_v9 = vld [vmem:[#allocation7_spill] sm:$0xff] }
 0x116   : > { %v2154_v30 = vsel %vm2146_vm10, %v2121_v42, %v1890_v59  ;;  %1785 = vrot.lane.b32.xlu1 %v1754_v33, %s3252_s21  ;;  %2935 = vmatmul.mubr.msk.bf16.gmra.mrb[4].mxu1 %vm2206_vm11, %v2170_v12  ;;  %v4694_v42 = vld [vmem:[#allocation8_spill] sm:$0xff] }
 0x117   : > { %1769 = vrot.lane.b32.xlu0 %v1658_v39, %s3252_s21  ;;  %2919 = vmatmul.mubr.msk.bf16.gmra.mrb[4].mxu0 %vm2206_vm11, %v2154_v30  ;;  %s3170_s21 = sshll.u32 %s3254_s19, 4  ;;  %s3171_s21 = int_to_ptr.vmem [resolvable:$false] %s3170_s21 }
 0x118   : > { %v757_v38 = vpop.permute.xlu1 %756  ;;  %p3173_p1 = scmp.lt.s32.totalorder %s4623_s8, %s3171_s21 }
 0x119   : > { %v741_v58 = vpop.permute.xlu0 %740  ;;  %v1943_v39 = vsel %vm1915_vm3, %v4693_v9, %v757_v38 }
 0x11a   : > { %1911 = vrot.lane.b32.xlu1 %v1879_v22, %s3253_s23  ;;  %v1927_v12 = vsel %vm1915_vm3, %v4694_v42, %v741_v58 }
 0x11b   : > { %1895 = vrot.lane.b32.xlu0 %v1855_v1, %s3253_s23 }
 0x11c   : > { %v884_v16 = vpop.permute.xlu1 %883 }
 0x11d   : > { %v868_v43 = vpop.permute.xlu0 %867  ;;  %v1974_v0 = vsel %vm1948_vm4, %v1941_v32, %v884_v16 }
 0x11e   : > { %1913 = vrot.lane.b32.xlu1 %v1882_v63, %s3253_s23  ;;  %v1958_v57 = vsel %vm1948_vm4, %v1925_v47, %v868_v43 }
 0x11f   : > { %1897 = vrot.lane.b32.xlu0 %v1858_v14, %s3253_s23  ;;  %s3172_s23 = scalar_lea.vmem %s3171_s21, 8192 }
 0x120   : > { %v886_v2 = vpop.permute.xlu1 %885  ;;  %p3174_p2 = scmp.lt.s32.totalorder %s3172_s23, %s3166_s18 }
 0x121   : > { %v870_v55 = vpop.permute.xlu0 %869  ;;  %v1976_v59 = vsel %vm1948_vm4, %v1943_v39, %v886_v2 }
 0x122   : > { %v1960_v30 = vsel %vm1948_vm4, %v1927_v12, %v870_v55  ;;  %p3175_p3 = por %p3174_p2, %p3173_p1 }
 0x124   : > { %v996_v19 = vpop.permute.xlu1 %995  ;;  %p3176_p5 = pnand %p3175_p3, %p3169_p0 }
 0x125   : > { %v980_v23 = vpop.permute.xlu0 %979  ;;  %v2007_v33 = vsel %vm1981_vm5, %v1974_v0, %v996_v19 }
 0x126   : > { %v1991_v24 = vsel %vm1981_vm5, %v1958_v57, %v980_v23 }
 0x128   : > { %v998_v31 = vpop.permute.xlu1 %997 }
 0x129   : > { %v982_v41 = vpop.permute.xlu0 %981  ;;  %v2009_v22 = vsel %vm1981_vm5, %v1976_v59, %v998_v31 }
 0x12a   : > { %v1993_v8 = vsel %vm1981_vm5, %v1960_v30, %v982_v41 }
 0x12c   : > { %v1268_v48 = vpop.permute.xlu1 %1267 }
 0x12d   : > { %v1252_v17 = vpop.permute.xlu0 %1251  ;;  %v2040_v27 = vsel %vm2014_vm6, %v2007_v33, %v1268_v48 }
 0x12e   : > { %v2024_v11 = vsel %vm2014_vm6, %v1991_v24, %v1252_v17 }
 0x130   : > { %v1270_v10 = vpop.permute.xlu1 %1269 }
 0x131   : > { %v1254_v25 = vpop.permute.xlu0 %1253  ;;  %v2042_v38 = vsel %vm2014_vm6, %v2009_v22, %v1270_v10 }
 0x132   : > { %v2026_v62 = vsel %vm2014_vm6, %v1993_v8, %v1254_v25 }
 0x134   : > { %v1396_v7 = vpop.permute.xlu1 %1395 }
 0x135   : > { %v1380_v18 = vpop.permute.xlu0 %1379  ;;  %v2073_v53 = vsel %vm2047_vm7, %v2040_v27, %v1396_v7 }
 0x136   : > { %v2057_v40 = vsel %vm2047_vm7, %v2024_v11, %v1380_v18 }
 0x138   : > { %v1398_v6 = vpop.permute.xlu1 %1397 }
 0x139   : > { %v1382_v61 = vpop.permute.xlu0 %1381  ;;  %v2075_v49 = vsel %vm2047_vm7, %v2042_v38, %v1398_v6 }
 0x13a   : > { %v2059_v58 = vsel %vm2047_vm7, %v2026_v62, %v1382_v61 }
 0x13c   : > { %v1508_v5 = vpop.permute.xlu1 %1507 }
 0x13d   : > { %v1492_v13 = vpop.permute.xlu0 %1491  ;;  %v2106_v51 = vsel %vm2080_vm8, %v2073_v53, %v1508_v5 }
 0x13e   : > { %v2090_v21 = vsel %vm2080_vm8, %v2057_v40, %v1492_v13 }
 0x140   : > { %v1510_v4 = vpop.permute.xlu1 %1509 }
 0x141   : > { %v1494_v37 = vpop.permute.xlu0 %1493  ;;  %v2108_v63 = vsel %vm2080_vm8, %v2075_v49, %v1510_v4 }
 0x142   : > { %v2092_v16 = vsel %vm2080_vm8, %v2059_v58, %v1494_v37 }
 0x144   : > { %v1780_v28 = vpop.permute.xlu1 %1779 }
 0x145   : > { %v1764_v3 = vpop.permute.xlu0 %1763  ;;  %v2139_v20 = vsel %vm2113_vm9, %v2106_v51, %v1780_v28 }
 0x146   : > { %v2123_v52 = vsel %vm2113_vm9, %v2090_v21, %v1764_v3 }
 0x148   : > { %v1782_v60 = vpop.permute.xlu1 %1781 }
 0x149   : > { %v1766_v54 = vpop.permute.xlu0 %1765  ;;  %v2141_v14 = vsel %vm2113_vm9, %v2108_v63, %v1782_v60 }
 0x14a   : > { %v2125_v2 = vsel %vm2113_vm9, %v2092_v16, %v1766_v54 }
 0x14c   : > { %v1908_v36 = vpop.permute.xlu1 %1907 }
 0x14d   : > { %v2172_v45 = vsel %vm2146_vm10, %v2139_v20, %v1908_v36  ;;  %v1892_v26 = vpop.permute.xlu0 %1891 }
 0x14e   : > { %v2156_v35 = vsel %vm2146_vm10, %v2123_v52, %v1892_v26  ;;  %2938 = vmatprep.mubr.msk.bf16.mxu1 %vm2206_vm11, %v2172_v45 }
 0x14f   : > { %2922 = vmatprep.mubr.msk.bf16.mxu0 %vm2206_vm11, %v2156_v35 }
 0x150   : > { %v759_v56 = vpop.permute.xlu1 %758 }
 0x151   : > { %v743_v1 = vpop.permute.xlu0 %742  ;;  %v1945_v24 = vsel %vm1915_vm3, %v4055_v46, %v759_v56 }
 0x152   : > { %v1929_v27 = vsel %vm1915_vm3, %v4064_v15, %v743_v1 }
 0x154   : > { %v1910_v43 = vpop.permute.xlu1 %1909 }
 0x155   : > { %v2174_v55 = vsel %vm2146_vm10, %v2141_v14, %v1910_v43  ;;  %v1894_v19 = vpop.permute.xlu0 %1893 }
 0x156   : > { %v2158_v23 = vsel %vm2146_vm10, %v2125_v2, %v1894_v19  ;;  %2939 = vmatmul.mubr.msk.bf16.gmra.mrb[8].mxu1 %vm2206_vm11, %v2174_v55  ;;  %v4549_v19 = vld [vmem:[%s4679_s2] ss:$0 sm:$0xff] }
 0x157   : > { %2923 = vmatmul.mubr.msk.bf16.gmra.mrb[8].mxu0 %vm2206_vm11, %v2158_v23 }
 0x158   : > { %v761_v31 = vpop.permute.xlu1 %760 }
 0x159   : > { %v745_v41 = vpop.permute.xlu0 %744  ;;  %v1947_v36 = vsel %vm1915_vm3, %v4130_v50, %v761_v31 }
 0x15a   : > { %v1931_v15 = vsel %vm1915_vm3, %v4137_v34, %v745_v41 }
 0x15c   : > { %v888_v48 = vpop.permute.xlu1 %887 }
 0x15d   : > { %v872_v17 = vpop.permute.xlu0 %871  ;;  %v1978_v54 = vsel %vm1948_vm4, %v1945_v24, %v888_v48 }
 0x15e   : > { %v1962_v11 = vsel %vm1948_vm4, %v1929_v27, %v872_v17 }
 0x160   : > { %v890_v10 = vpop.permute.xlu1 %889 }
 0x161   : > { %v874_v25 = vpop.permute.xlu0 %873  ;;  %v1980_v45 = vsel %vm1948_vm4, %v1947_v36, %v890_v10 }
 0x162   : > { %v1964_v39 = vsel %vm1948_vm4, %v1931_v15, %v874_v25 }
 0x164   : > { %v1000_v7 = vpop.permute.xlu1 %999 }
 0x165   : > { %v984_v18 = vpop.permute.xlu0 %983  ;;  %v2011_v53 = vsel %vm1981_vm5, %v1978_v54, %v1000_v7 }
 0x166   : > { %v1995_v51 = vsel %vm1981_vm5, %v1962_v11, %v984_v18 }
 0x168   : > { %v1002_v6 = vpop.permute.xlu1 %1001 }
 0x169   : > { %v986_v61 = vpop.permute.xlu0 %985  ;;  %v2013_v35 = vsel %vm1981_vm5, %v1980_v45, %v1002_v6 }
 0x16a   : > { %v1997_v59 = vsel %vm1981_vm5, %v1964_v39, %v986_v61 }
 0x16c   : > { %v1272_v5 = vpop.permute.xlu1 %1271 }
 0x16d   : > { %v1256_v13 = vpop.permute.xlu0 %1255  ;;  %v2044_v21 = vsel %vm2014_vm6, %v2011_v53, %v1272_v5 }
 0x16e   : > { %v2028_v46 = vsel %vm2014_vm6, %v1995_v51, %v1256_v13 }
 0x170   : > { %v1274_v4 = vpop.permute.xlu1 %1273 }
 0x171   : > { %v1258_v37 = vpop.permute.xlu0 %1257  ;;  %v2046_v30 = vsel %vm2014_vm6, %v2013_v35, %v1274_v4 }
 0x172   : > { %v2030_v8 = vsel %vm2014_vm6, %v1997_v59, %v1258_v37 }
 0x174   : > { %v1400_v28 = vpop.permute.xlu1 %1399 }
 0x175   : > { %v1384_v3 = vpop.permute.xlu0 %1383  ;;  %v2077_v52 = vsel %vm2047_vm7, %v2044_v21, %v1400_v28 }
 0x176   : > { %v2061_v26 = vsel %vm2047_vm7, %v2028_v46, %v1384_v3 }
 0x178   : > { %v1402_v29 = vpop.permute.xlu1 %1401 }
 0x179   : > { %v1386_v32 = vpop.permute.xlu0 %1385  ;;  %v2079_v38 = vsel %vm2047_vm7, %v2046_v30, %v1402_v29 }
 0x17a   : > { %v2063_v62 = vsel %vm2047_vm7, %v2030_v8, %v1386_v32 }
 0x17c   : > { %v1512_v44 = vpop.permute.xlu1 %1511 }
 0x17d   : > { %v1496_v47 = vpop.permute.xlu0 %1495  ;;  %v2110_v9 = vsel %vm2080_vm8, %v2077_v52, %v1512_v44 }
 0x17e   : > { %v2094_v42 = vsel %vm2080_vm8, %v2061_v26, %v1496_v47 }
 0x180   : > { %v1514_v0 = vpop.permute.xlu1 %1513 }
 0x181   : > { %v1498_v57 = vpop.permute.xlu0 %1497  ;;  %v2112_v49 = vsel %vm2080_vm8, %v2079_v38, %v1514_v0 }
 0x182   : > { %v2096_v58 = vsel %vm2080_vm8, %v2063_v62, %v1498_v57 }
 0x184   : > { %v1784_v33 = vpop.permute.xlu1 %1783 }
 0x185   : > { %v1768_v60 = vpop.permute.xlu0 %1767  ;;  %v2143_v50 = vsel %vm2113_vm9, %v2110_v9, %v1784_v33 }
 0x186   : > { %v2127_v34 = vsel %vm2113_vm9, %v2094_v42, %v1768_v60 }
 0x188   : > { %v1786_v40 = vpop.permute.xlu1 %1785 }
 0x189   : > { %v1770_v20 = vpop.permute.xlu0 %1769  ;;  %v2145_v63 = vsel %vm2113_vm9, %v2112_v49, %v1786_v40 }
 0x18a   : > { %v2129_v14 = vsel %vm2113_vm9, %v2096_v58, %v1770_v20 }
 0x18c   : > { %v1912_v12 = vpop.permute.xlu1 %1911 }
 0x18d   : > { %v2176_v22 = vsel %vm2146_vm10, %v2143_v50, %v1912_v12  ;;  %v1896_v56 = vpop.permute.xlu0 %1895 }
 0x18e   : > { %v2160_v1 = vsel %vm2146_vm10, %v2127_v34, %v1896_v56  ;;  %2942 = vmatprep.mubr.msk.bf16.mxu1 %vm2206_vm11, %v2176_v22 }
 0x18f   : > { %2926 = vmatprep.mubr.msk.bf16.mxu0 %vm2206_vm11, %v2160_v1 }
 0x190   : > { %v1914_v16 = vpop.permute.xlu1 %1913 }
 0x191   : > { %v2178_v43 = vsel %vm2146_vm10, %v2145_v63, %v1914_v16  ;;  %v1898_v2 = vpop.permute.xlu0 %1897 }
 0x192   : > { %v2162_v55 = vsel %vm2146_vm10, %v2129_v14, %v1898_v2  ;;  %2943 = vmatmul.mubr.msk.bf16.gmra.mrb[12].mxu1 %vm2206_vm11, %v2178_v43 }
 0x193   : > { %2927 = vmatmul.mubr.msk.bf16.gmra.mrb[12].mxu0 %vm2206_vm11, %v2162_v55 }
 0x1a9   : > { %v2932_v23 = vpop.f32.mrb[0].mxu1 }
 0x1aa   : > { %v2916_v31 = vpop.f32.mrb[0].mxu0  ;;  %v2350_v41 = vadd.f32 %v2932_v23, %v4549_v19  ;;  %v2341_v48 = vpop.f32.mrb[1].mxu1 }
 0x1ab   : > { %v2286_v17 = vadd.f32 %v2916_v31, %v4549_v19  ;;  %v2277_v10 = vpop.f32.mrb[1].mxu0  ;;  %v2342_v25 = vadd.f32 %v4549_v19, %v2341_v48  ;;  %v2933_v7 = vpop.f32.mrb[2].mxu1 }
 0x1ac   : > { %v2422_v18 = vmax.f32 %v2350_v41, 0.0  ;;  %v2278_v6 = vadd.f32 %v4549_v19, %v2277_v10  ;;  %v2917_v61 = vpop.f32.mrb[2].mxu0  ;;  %v2353_v5 = vadd.f32 %v2933_v7, %v4549_v19  ;;  %v2344_v13 = vpop.f32.mrb[3].mxu1 }
 0x1ad   : > { %v2406_v4 = vmax.f32 %v2286_v17, 0.0  ;;  %v2420_v37 = vmax.f32 %v2342_v25, 0.0  ;;  %v2289_v28 = vadd.f32 %v2917_v61, %v4549_v19  ;;  %v2280_v3 = vpop.f32.mrb[3].mxu0  ;;  %v2345_v29 = vadd.f32 %v4549_v19, %v2344_v13 }
 0x1ae   : > { %2454 = vst [vmem:[%s4560_s6 + $0x90] sm:$0xff] %v2422_v18  ;;  %v2404_v32 = vmax.f32 %v2278_v6, 0.0  ;;  %v2423_v44 = vmax.f32 %v2353_v5, 0.0  ;;  %v2281_v47 = vadd.f32 %v4549_v19, %v2280_v3 }
 0x1af   : > { %2438 = vst [vmem:[%s4560_s6 + $0x10] sm:$0xff] %v2406_v4  ;;  %2452 = vst [vmem:[%s4560_s6 + $0x80] sm:$0xff] %v2420_v37  ;;  %v2407_v0 = vmax.f32 %v2289_v28, 0.0  ;;  %v2421_v57 = vmax.f32 %v2345_v29, 0.0 }
 0x1b0   : > { %2436 = vst [vmem:[%s4560_s6] sm:$0xff] %v2404_v32  ;;  %2455 = vst [vmem:[%s4560_s6 + $0x98] sm:$0xff] %v2423_v44  ;;  %v2405_v33 = vmax.f32 %v2281_v47, 0.0 }
 0x1b1   : > { %2439 = vst [vmem:[%s4560_s6 + $0x18] sm:$0xff] %v2407_v0  ;;  %2453 = vst [vmem:[%s4560_s6 + $0x88] sm:$0xff] %v2421_v57 }
 0x1b2   : > { %2437 = vst [vmem:[%s4560_s6 + $0x8] sm:$0xff] %v2405_v33 }
 0x1e9   : > { %v2936_v60 = vpop.f32.mrb[4].mxu1 }
 0x1ea   : > { %v2920_v24 = vpop.f32.mrb[4].mxu0  ;;  %v2366_v27 = vadd.f32 %v2936_v60, %v4549_v19  ;;  %v2357_v54 = vpop.f32.mrb[5].mxu1 }
 0x1eb   : > { %v2302_v11 = vadd.f32 %v2920_v24, %v4549_v19  ;;  %v2293_v53 = vpop.f32.mrb[5].mxu0  ;;  %v2358_v40 = vadd.f32 %v4549_v19, %v2357_v54  ;;  %v2937_v51 = vpop.f32.mrb[6].mxu1 }
 0x1ec   : > { %v2426_v21 = vmax.f32 %v2366_v27, 0.0  ;;  %v2294_v20 = vadd.f32 %v4549_v19, %v2293_v53  ;;  %v2921_v36 = vpop.f32.mrb[6].mxu0  ;;  %v2369_v46 = vadd.f32 %v2937_v51, %v4549_v19  ;;  %v2360_v52 = vpop.f32.mrb[7].mxu1 }
 0x1ed   : > { %v2410_v15 = vmax.f32 %v2302_v11, 0.0  ;;  %v2424_v45 = vmax.f32 %v2358_v40, 0.0  ;;  %v2305_v26 = vadd.f32 %v2921_v36, %v4549_v19  ;;  %v2296_v9 = vpop.f32.mrb[7].mxu0  ;;  %v2361_v39 = vadd.f32 %v4549_v19, %v2360_v52 }
 0x1ee   : > { %2458 = vst [vmem:[%s4560_s6 + $0xb0] sm:$0xff] %v2426_v21  ;;  %v2408_v35 = vmax.f32 %v2294_v20, 0.0  ;;  %v2427_v42 = vmax.f32 %v2369_v46, 0.0  ;;  %v2297_v50 = vadd.f32 %v4549_v19, %v2296_v9 }
 0x1ef   : > { %2442 = vst [vmem:[%s4560_s6 + $0x30] sm:$0xff] %v2410_v15  ;;  %2456 = vst [vmem:[%s4560_s6 + $0xa0] sm:$0xff] %v2424_v45  ;;  %v2411_v12 = vmax.f32 %v2305_v26, 0.0  ;;  %v2425_v59 = vmax.f32 %v2361_v39, 0.0 }
 0x1f0   : > { %2440 = vst [vmem:[%s4560_s6 + $0x20] sm:$0xff] %v2408_v35  ;;  %2459 = vst [vmem:[%s4560_s6 + $0xb8] sm:$0xff] %v2427_v42  ;;  %v2409_v30 = vmax.f32 %v2297_v50, 0.0 }
 0x1f1   : > { %2443 = vst [vmem:[%s4560_s6 + $0x38] sm:$0xff] %v2411_v12  ;;  %2457 = vst [vmem:[%s4560_s6 + $0xa8] sm:$0xff] %v2425_v59 }
 0x1f2   : > { %2441 = vst [vmem:[%s4560_s6 + $0x28] sm:$0xff] %v2409_v30 }
 0x229   : > { %v2940_v34 = vpop.f32.mrb[8].mxu1 }
 0x22a   : > { %v2924_v22 = vpop.f32.mrb[8].mxu0  ;;  %v2382_v56 = vadd.f32 %v2940_v34, %v4549_v19  ;;  %v2373_v8 = vpop.f32.mrb[9].mxu1 }
 0x22b   : > { %v2318_v38 = vadd.f32 %v2924_v22, %v4549_v19  ;;  %v2309_v1 = vpop.f32.mrb[9].mxu0  ;;  %v2374_v62 = vadd.f32 %v4549_v19, %v2373_v8  ;;  %v2941_v49 = vpop.f32.mrb[10].mxu1 }
 0x22c   : > { %v2430_v58 = vmax.f32 %v2382_v56, 0.0  ;;  %v2310_v63 = vadd.f32 %v4549_v19, %v2309_v1  ;;  %v2925_v16 = vpop.f32.mrb[10].mxu0  ;;  %v2385_v14 = vadd.f32 %v2941_v49, %v4549_v19  ;;  %v2376_v43 = vpop.f32.mrb[11].mxu1 }
 0x22d   : > { %v2414_v2 = vmax.f32 %v2318_v38, 0.0  ;;  %v2428_v55 = vmax.f32 %v2374_v62, 0.0  ;;  %v2321_v23 = vadd.f32 %v2925_v16, %v4549_v19  ;;  %v2312_v31 = vpop.f32.mrb[11].mxu0  ;;  %v2377_v41 = vadd.f32 %v4549_v19, %v2376_v43 }
 0x22e   : > { %2462 = vst [vmem:[%s4560_s6 + $0xd0] sm:$0xff] %v2430_v58  ;;  %v2412_v48 = vmax.f32 %v2310_v63, 0.0  ;;  %v2431_v17 = vmax.f32 %v2385_v14, 0.0  ;;  %v2313_v10 = vadd.f32 %v4549_v19, %v2312_v31 }
 0x22f   : > { %2446 = vst [vmem:[%s4560_s6 + $0x50] sm:$0xff] %v2414_v2  ;;  %2460 = vst [vmem:[%s4560_s6 + $0xc0] sm:$0xff] %v2428_v55  ;;  %v2415_v25 = vmax.f32 %v2321_v23, 0.0  ;;  %v2429_v7 = vmax.f32 %v2377_v41, 0.0 }
 0x230   : > { %2444 = vst [vmem:[%s4560_s6 + $0x40] sm:$0xff] %v2412_v48  ;;  %2463 = vst [vmem:[%s4560_s6 + $0xd8] sm:$0xff] %v2431_v17  ;;  %v2413_v18 = vmax.f32 %v2313_v10, 0.0 }
 0x231   : > { %2447 = vst [vmem:[%s4560_s6 + $0x58] sm:$0xff] %v2415_v25  ;;  %2461 = vst [vmem:[%s4560_s6 + $0xc8] sm:$0xff] %v2429_v7 }
 0x232   : > { %2445 = vst [vmem:[%s4560_s6 + $0x48] sm:$0xff] %v2413_v18 }
 0x265   : > { %v2944_v6 = vpop.f32.mrb[12].mxu1 }
 0x266   : > { %v2928_v61 = vpop.f32.mrb[12].mxu0  ;;  %v2398_v5 = vadd.f32 %v2944_v6, %v4549_v19  ;;  %v2389_v13 = vpop.f32.mrb[13].mxu1 }
 0x267   : > { %v2334_v4 = vadd.f32 %v2928_v61, %v4549_v19  ;;  %v2325_v37 = vpop.f32.mrb[13].mxu0  ;;  %v2390_v28 = vadd.f32 %v4549_v19, %v2389_v13  ;;  %v2945_v3 = vpop.f32.mrb[14].mxu1 }
 0x268   : > { %v2434_v29 = vmax.f32 %v2398_v5, 0.0  ;;  %v2326_v32 = vadd.f32 %v4549_v19, %v2325_v37  ;;  %v2929_v44 = vpop.f32.mrb[14].mxu0  ;;  %v2401_v47 = vadd.f32 %v2945_v3, %v4549_v19  ;;  %v2392_v0 = vpop.f32.mrb[15].mxu1 }
 0x269   : > { %v2418_v57 = vmax.f32 %v2334_v4, 0.0  ;;  %v2432_v33 = vmax.f32 %v2390_v28, 0.0  ;;  %v2337_v60 = vadd.f32 %v2929_v44, %v4549_v19  ;;  %v2328_v24 = vpop.f32.mrb[15].mxu0  ;;  %v2393_v27 = vadd.f32 %v4549_v19, %v2392_v0 }
 0x26a   : > { %2466 = vst [vmem:[%s4560_s6 + $0xf0] sm:$0xff] %v2434_v29  ;;  %v2416_v54 = vmax.f32 %v2326_v32, 0.0  ;;  %v2435_v11 = vmax.f32 %v2401_v47, 0.0  ;;  %v2329_v53 = vadd.f32 %v4549_v19, %v2328_v24 }
 0x26b   : > { %2450 = vst [vmem:[%s4560_s6 + $0x70] sm:$0xff] %v2418_v57  ;;  %2464 = vst [vmem:[%s4560_s6 + $0xe0] sm:$0xff] %v2432_v33  ;;  %v2419_v40 = vmax.f32 %v2337_v60, 0.0  ;;  %v2433_v51 = vmax.f32 %v2393_v27, 0.0 }
 0x26c   : > { %2448 = vst [vmem:[%s4560_s6 + $0x60] sm:$0xff] %v2416_v54  ;;  %2467 = vst [vmem:[%s4560_s6 + $0xf8] sm:$0xff] %v2435_v11  ;;  %v2417_v21 = vmax.f32 %v2329_v53, 0.0 }
 0x26d   : > { %2451 = vst [vmem:[%s4560_s6 + $0x78] sm:$0xff] %v2419_v40  ;;  %2465 = vst [vmem:[%s4560_s6 + $0xe8] sm:$0xff] %v2433_v51 }
 0x26e   : > { %2449 = vst [vmem:[%s4560_s6 + $0x68] sm:$0xff] %v2417_v21 }
 0x26f   : > { %3179 = shalt.err (!%p3176_p5)
}
 0x270   : > { %s3180_s26 = scalar_lea.hbm %s4619_s10, 4096  ;;  %s3184_s29 = scalar_lea.hbm %s4680_s3, 8192 }
 0x271   : > { %p3181_p6 = scmp.ne.s32.totalorder %s4619_s10, %s3180_s26  ;;  %p3185_p10 = scmp.lt.u32.totalorder %s4619_s10, %s4680_s3 }
 0x272   : > { %p3186_p11 = scmp.lt.u32.totalorder %s3184_s29, %s3180_s26  ;;  %p3188_p13 = scmp.lt.u32.totalorder %s3180_s26, %s4619_s10 }
 0x273   : > { %p3182_p7 = pnand %p3181_p6, %p3316_p4 }
 0x274   : > { %p3187_p12 = por %p3186_p11, %p3185_p10 }
 0x275   : > { %p3183_p9 = pneg %p3182_p7 }
 0x276   : > { %p3189_p0 = por %p3188_p13, %p3187_p12 }
 0x278   : > { %p3190_p1 = pnand %p3189_p0, %p3183_p9 }
 0x27a   : > { %3193 = shalt.err (!%p3190_p1)
}
 0x27b   : > { %s3255_s6 = smov 128  }
 0x27c   : > { %2955 = dma.vmem_to_hbm [thread:$0]  (%p3316_p4), %s4623_s8, 4096, %s4619_s10, %s4630_s11, %s3255_s6, %s3255_s6, %s3247_s5  }
 0x27d PF: > { %p2961_p2 = scmp.ge.s32.totalorder %s3244_s17, 2  ;;  %s2498_s7 = sand.u32 1, %s3224_s12  }
 0x27e   : > { %s2499_s15 = scalar_lea.sflag [#allocation3], %s2498_s7 }
 0x27f   : > { %p2958_p3 = pnand %p2961_p2, %p3323_p8 }
 0x281   : > { %3219 = dma.done.wait (!%p2958_p3), %s2499_s15, 4096  }
 0x282   : > { %3221 = vsyncadd (!%p2958_p3), %s2499_s15, 4294963200  ;;  %s16_s17 = sadd.s32 1, %s3244_s17   ;;  %s4695_s12 = smov %s3228_s13 }
 0x283   : > { %p13_p5 = scmp.ge.s32.totalorder %s16_s17, 4   ;;  %s4696_s13 = smov %s3232_s14 }
 0x284   : > { %s4697_s14 = smov %s3329_s25  ;;  %s4698_s15 = smov %s3240_s16 }
 0x285   : > { %s4699_s16 = smov %s4701_s20  ;;  %15 = sbr.rel (!%p13_p5) target bundleno = 4 (0x4), region = 75 }
 0x28c   :  { %2504 = vsyncpa [#allocation3], 1 }
 0x28d   :  { %2506 = vsyncpa [#allocation3 + $0x1], 1 }

</bundles_post_ra>
